<compile_context>
chip_gen: v7x
topology: tpu7x:2x2x1
jax: 0.10.0
libtpu: 0.0.40
codegen_flags: <defaults>
</compile_context>

<pallas_src>
import functools

import jax
import jax.numpy as jnp
from jax import lax
from jax.experimental import pallas as pl
from jax.experimental.pallas import tpu as pltpu


def _round_up(x, m):
    return ((x + m - 1) // m) * m


def _pack_params(params, I, E, H, num_layers):
    """Packs all weights into one bf16 slab and all biases into one f32 slab.

    Every weight block is zero-padded to W_COLS = 4*E output columns and its K
    (row) dimension rounded up to the bf16 sublane pack (16) so all static row
    offsets are tile-aligned.  wc2 is additionally K-padded to W_COLS rows so
    the classifier's second matmul consumes the full 128-lane ReLU output with
    no lane slicing (padded lanes are exactly zero).
    """
    W_COLS = 4 * E
    assert W_COLS % 128 == 0, "4*encoded_size must be a multiple of 128 lanes"
    assert E % 16 == 0, "encoded/hidden size must be a multiple of 16"
    I_pad = _round_up(I, 16)

    names, blocks = [], []

    def add(name, w, k_pad=None):
        K, N = w.shape
        kp = _round_up(K, 16) if k_pad is None else k_pad
        names.append(name)
        blocks.append(jnp.pad(w.astype(jnp.float32),
                              ((0, kp - K), (0, W_COLS - N))))

    for l in range(num_layers):
        wih, whh, _ = params["enc"][l]
        add(f"enc_wih_{l}", wih, k_pad=(I_pad if l == 0 else None))
        add(f"enc_whh_{l}", whh)
    for l in range(num_layers):
        wih, whh, _ = params["dec"][l]
        add(f"dec_wih_{l}", wih)
        add(f"dec_whh_{l}", whh)
    add("wfc", params["wfc"])
    add("wc1", params["wc1"])
    add("wc2", params["wc2"], k_pad=W_COLS)   # K-padded: zero rows past E

    w_offsets, row = {}, 0
    for n, blk in zip(names, blocks):
        w_offsets[n] = (row, blk.shape[0])
        row += blk.shape[0]
    w_slab = jnp.concatenate(blocks, axis=0).astype(jnp.bfloat16)

    bias_names = ([f"enc_b_{l}" for l in range(num_layers)]
                  + [f"dec_b_{l}" for l in range(num_layers)]
                  + ["bfc", "bc1", "bc2"])
    bias_vals = ([params["enc"][l][2] for l in range(num_layers)]
                 + [params["dec"][l][2] for l in range(num_layers)]
                 + [params["bfc"], params["bc1"], params["bc2"]])
    b_index = {n: i for i, n in enumerate(bias_names)}
    b_slab = jnp.concatenate(
        [jnp.pad(b.astype(jnp.float32), ((0, 0), (0, W_COLS - b.shape[1])))
         for b in bias_vals], axis=0)

    return w_slab, b_slab, w_offsets, b_index, W_COLS, I_pad


def _make_kernel(B, T, E, num_layers, W_COLS, w_offsets, b_index):
    """Builds the fused forward kernel (encoder + classifier + decoder)."""
    G = 4 * E  # packed gate width; == W_COLS (E == H asserted in the wrapper)

    def kernel(x_ref, w_ref, b_ref, dec_out_ref, pred_out_ref):
        # Hoisted lane mask selecting the tanh ('g') range of the packed gates
        # (JAX does not CSE broadcasts, so compute it exactly once).
        lane = lax.broadcasted_iota(jnp.int32, (B, G), 1)
        is_g = jnp.logical_and(lane >= 2 * E, lane < 3 * E)

        b_all = b_ref[...]                      # (n_bias, W_COLS) f32, one load

        def w_block(name):
            off, k = w_offsets[name]            # static Python ints
            return w_ref[pl.ds(off, k), :]      # one aligned slab slice / use

        def bias(name):
            i = b_index[name]
            return b_all[i:i + 1, :]            # (1, W_COLS) f32 value slice

        def packed_act(gates):
            # One EUP tanh per step: sigmoid(x) = 0.5*(tanh(x/2)+1) for the
            # i/f/o lanes, plain tanh for the g lanes, mixed by is_g.
            y = jnp.where(is_g, gates, 0.5 * gates)
            t = jnp.tanh(y)
            return jnp.where(is_g, t, 0.5 * t + 0.5)

        def lstm_layer(proj_at, w_hh):
            """T unrolled steps; h/c and outputs stay in vregs (no scratch)."""
            h = jnp.zeros((B, E), jnp.float32)
            c = jnp.zeros((B, E), jnp.float32)
            hs = []
            for t in range(T):
                gates = proj_at(t)              # hoisted input projection
                if t > 0:                       # h0 == 0 -> skip at t == 0
                    gates = gates + jnp.dot(h.astype(jnp.bfloat16), w_hh,
                                            preferred_element_type=jnp.float32)
                acts = packed_act(gates)
                i_g = acts[:, 0 * E:1 * E]
                f_g = acts[:, 1 * E:2 * E]
                g_g = acts[:, 2 * E:3 * E]
                o_g = acts[:, 3 * E:4 * E]
                c = f_g * c + i_g * g_g
                h = o_g * jnp.tanh(c)
                hs.append(h)
            # Dense (T*B, E) sequence assembled in registers — no per-step
            # masked 2-row stores into a VMEM scratch slab.
            return jnp.concatenate(hs, axis=0), h

        # ------------------------------ encoder ------------------------------
        inp = x_ref[...]                        # (T*B, I_pad) bf16
        enc_seq = enc_last = None
        for l in range(num_layers):
            w_hh = w_block(f"enc_whh_{l}")
            # Full-sequence input projection: single matmul, off the serial path.
            proj = (jnp.dot(inp, w_block(f"enc_wih_{l}"),
                            preferred_element_type=jnp.float32)
                    + bias(f"enc_b_{l}"))
            enc_seq, enc_last = lstm_layer(
                lambda t, proj=proj: proj[t * B:(t + 1) * B, :], w_hh)
            inp = enc_seq.astype(jnp.bfloat16)

        # -------------------------- classifier head --------------------------
        # wc1/bc1 are column-padded with zeros and wc2 is K-padded with zero
        # rows, so the full 128-lane intermediate is exact and lane-dense.
        p = (jnp.dot(enc_seq.astype(jnp.bfloat16), w_block("wc1"),
                     preferred_element_type=jnp.float32) + bias("bc1"))
        p = jnp.maximum(p, 0.0).astype(jnp.bfloat16)       # (T*B, W_COLS)
        pred_out_ref[...] = (jnp.dot(p, w_block("wc2"),
                                     preferred_element_type=jnp.float32)
                             + bias("bc2"))                # lane-dense store

        # ------------------------------ decoder ------------------------------
        dec_seq = None
        for l in range(num_layers):
            w_hh = w_block(f"dec_whh_{l}")
            if l == 0:
                # Constant input (enc_last) for every step: project ONCE.
                p0 = (jnp.dot(enc_last.astype(jnp.bfloat16),
                              w_block("dec_wih_0"),
                              preferred_element_type=jnp.float32)
                      + bias("dec_b_0"))
                dec_seq, _ = lstm_layer(lambda t, p0=p0: p0, w_hh)
            else:
                proj = (jnp.dot(dec_seq.astype(jnp.bfloat16),
                                w_block(f"dec_wih_{l}"),
                                preferred_element_type=jnp.float32)
                        + bias(f"dec_b_{l}"))
                dec_seq, _ = lstm_layer(
                    lambda t, proj=proj: proj[t * B:(t + 1) * B, :], w_hh)

        # Batched output projection (wfc column-padded -> lane-dense store).
        dec_out_ref[...] = (jnp.dot(dec_seq.astype(jnp.bfloat16),
                                    w_block("wfc"),
                                    preferred_element_type=jnp.float32)
                            + bias("bfc"))

    return kernel


def lstm_autoencoder_forward(x, params, *, num_layers, sequence_length):
    B, T, I = x.shape
    assert T == sequence_length and T >= 2
    E = params["enc"][0][1].shape[0]      # W_hh encoder: (E, 4E)
    H = params["dec"][0][1].shape[0]      # W_hh decoder: (H, 4H)
    # The PyTorch module only works when encoded_size == hidden_size.
    assert E == H, "LSTM_autoencoder requires encoded_size == hidden_size"

    w_slab, b_slab, w_offsets, b_index, W_COLS, I_pad = _pack_params(
        params, I, E, H, num_layers)

    # Time-major flat layout (step t = rows [t*B, (t+1)*B)); pad features to
    # the padded K of the first encoder weight block (zeros contribute zero).
    x_tb = jnp.transpose(x, (1, 0, 2)).reshape(T * B, I)
    x_tb = jnp.pad(x_tb, ((0, 0), (0, I_pad - I))).astype(jnp.bfloat16)

    vmem = pl.BlockSpec(memory_space=pltpu.MemorySpace.VMEM)
    kernel = _make_kernel(B, T, E, num_layers, W_COLS, w_offsets, b_index)
    # Grid-less, whole-model-in-VMEM: correct & fastest at these tiny shapes.
    # (See scaling notes at the top for large B/T/H.)
    dec_flat, pred_flat = pl.pallas_call(
        kernel,
        out_shape=(jax.ShapeDtypeStruct((T * B, W_COLS), jnp.float32),
                   jax.ShapeDtypeStruct((T * B, W_COLS), jnp.float32)),
        in_specs=[vmem, vmem, vmem],
        out_specs=(vmem, vmem),
    )(x_tb, w_slab, b_slab)

    # Wrapper glue: strip lane padding, back to (B, T, I), torch.cat shift.
    decoded = jnp.transpose(dec_flat[:, :I].reshape(T, B, I), (1, 0, 2))
    pred_raw = jnp.transpose(pred_flat[:, :I].reshape(T, B, I), (1, 0, 2))
    predictions = jnp.concatenate([x[:, 1:2, :], pred_raw[:, :-1, :]], axis=1)
    return decoded, predictions


def init_params(key, input_size, encoded_size, hidden_size, num_layers):
    """Deterministic synthetic parameters (PyTorch-style uniform init scale).

    Note: b_ih + b_hh are folded into a single bias per layer; when loading a
    real PyTorch state_dict the two biases must be summed in the wrapper.
    """
    I, E, H = input_size, encoded_size, hidden_size
    keys = iter(jax.random.split(key, 6 * num_layers + 6))

    def uni(k, shape, scale):
        return jax.random.uniform(k, shape, jnp.float32, -scale, scale)

    params = {"enc": [], "dec": []}
    se = E ** -0.5
    for l in range(num_layers):
        in_dim = I if l == 0 else E
        params["enc"].append((uni(next(keys), (in_dim, 4 * E), se),
                              uni(next(keys), (E, 4 * E), se),
                              uni(next(keys), (1, 4 * E), se)))
    sh = H ** -0.5
    for l in range(num_layers):
        in_dim = E if l == 0 else H
        params["dec"].append((uni(next(keys), (in_dim, 4 * H), sh),
                              uni(next(keys), (H, 4 * H), sh),
                              uni(next(keys), (1, 4 * H), sh)))
    params["wfc"] = uni(next(keys), (H, I), sh)   # fc: Linear(H, I), pre-transposed
    params["bfc"] = uni(next(keys), (1, I), sh)
    params["wc1"] = uni(next(keys), (H, E), sh)   # fc_classifier1 (needs E == H)
    params["bc1"] = uni(next(keys), (1, E), sh)
    params["wc2"] = uni(next(keys), (E, I), E ** -0.5)  # fc_classifier2: Linear(E, I)
    params["bc2"] = uni(next(keys), (1, I), E ** -0.5)
    return params


def _lstm_cell_ref(x_t, h, c, w_ih, w_hh, b):
    """f32 reference LSTM cell (PyTorch gate order i, f, g, o)."""
    Hd = h.shape[-1]
    gates = x_t @ w_ih + h @ w_hh + b
    i = jax.nn.sigmoid(gates[:, 0 * Hd:1 * Hd])
    f = jax.nn.sigmoid(gates[:, 1 * Hd:2 * Hd])
    g = jnp.tanh(gates[:, 2 * Hd:3 * Hd])
    o = jax.nn.sigmoid(gates[:, 3 * Hd:4 * Hd])
    c_new = f * c + i * g
    h_new = o * jnp.tanh(c_new)
    return h_new, c_new


def reference_forward(x, params, num_layers, sequence_length):
    """Pure-JAX f32 reference mirroring the PyTorch forward (for validation)."""
    B, T, I = x.shape
    E = params["enc"][0][1].shape[0]
    H = params["dec"][0][1].shape[0]

    h = [jnp.zeros((B, E)) for _ in range(num_layers)]
    c = [jnp.zeros((B, E)) for _ in range(num_layers)]
    enc_top = []
    for t in range(T):
        inp = x[:, t, :]
        for l in range(num_layers):
            wih, whh, b = params["enc"][l]
            h[l], c[l] = _lstm_cell_ref(inp, h[l], c[l], wih, whh, b)
            inp = h[l]
        enc_top.append(inp)
    enc_seq = jnp.stack(enc_top, axis=1)

    p = jnp.maximum(enc_seq @ params["wc1"] + params["bc1"], 0.0)
    pred_raw = p @ params["wc2"] + params["bc2"]
    predictions = jnp.concatenate([x[:, 1:2, :], pred_raw[:, :-1, :]], axis=1)

    enc_last = enc_top[-1]
    hd = [jnp.zeros((B, H)) for _ in range(num_layers)]
    cd = [jnp.zeros((B, H)) for _ in range(num_layers)]
    dec = []
    for _ in range(sequence_length):
        inp = enc_last
        for l in range(num_layers):
            wih, whh, b = params["dec"][l]
            hd[l], cd[l] = _lstm_cell_ref(inp, hd[l], cd[l], wih, whh, b)
            inp = hd[l]
        dec.append(inp @ params["wfc"] + params["bfc"])
    return jnp.stack(dec, axis=1), predictions


if __name__ == "__main__":
    # encoded_size == hidden_size is required by the PyTorch forward.
    B, T, I, E, H, L = 2, 8, 4, 32, 32, 1   # batch, seq, input, encoded, hidden, layers

    key = jax.random.PRNGKey(0)
    kx, kp = jax.random.split(key)
    x = jax.random.normal(kx, (B, T, I), jnp.float32)
    params = init_params(kp, I, E, H, L)

    fwd = jax.jit(functools.partial(lstm_autoencoder_forward,
                                    num_layers=L, sequence_length=T))
    decoded, predictions = fwd(x, params)
    jax.block_until_ready((decoded, predictions))

    ref_dec, ref_pred = reference_forward(x, params, L, T)
    assert decoded.shape == (B, T, I) and predictions.shape == (B, T, I)
    # bf16 MXU operands + the tanh-based sigmoid identity vs f32 reference.
    assert jnp.allclose(decoded, ref_dec, atol=2e-2, rtol=2e-2)
    assert jnp.allclose(predictions, ref_pred, atol=2e-2, rtol=2e-2)

    print("KERNEL_OK")
</pallas_src>

<mosaic_0001>
module attributes {stable_mosaic.version = 11 : i64} {
  func.func @kernel(%arg0: memref<16x16xbf16, #tpu.memory_space<vmem>>, %arg1: memref<304x128xbf16, #tpu.memory_space<vmem>>, %arg2: memref<5x128xf32, #tpu.memory_space<vmem>>, %arg3: memref<16x128xf32, #tpu.memory_space<vmem>>, %arg4: memref<16x128xf32, #tpu.memory_space<vmem>>) attributes {dimension_semantics = [], scalar_prefetch = 0 : i64, scratch_operands = 0 : i64, tpu.core_type = #tpu.core_type<tc>} {
    %0 = tpu.iota {dimensions = array<i32: 1>} : vector<2x128xi32>
    %c64_i32 = arith.constant 64 : i32
    %1 = vector.broadcast %c64_i32 : i32 to vector<2x128xi32>
    %2 = arith.cmpi sge, %0, %1 : vector<2x128xi32>
    %c96_i32 = arith.constant 96 : i32
    %3 = vector.broadcast %c96_i32 : i32 to vector<2x128xi32>
    %4 = arith.cmpi slt, %0, %3 : vector<2x128xi32>
    %5 = arith.andi %2, %4 : vector<2x128xi1>
    %c0 = arith.constant 0 : index
    %c0_0 = arith.constant 0 : index
    %6 = vector.load %arg2[%c0, %c0_0] : memref<5x128xf32, #tpu.memory_space<vmem>>, vector<5x128xf32>
    %c0_1 = arith.constant 0 : index
    %c0_2 = arith.constant 0 : index
    %7 = vector.load %arg0[%c0_1, %c0_2] : memref<16x16xbf16, #tpu.memory_space<vmem>>, vector<16x16xbf16>
    %c16 = arith.constant 16 : index
    %c0_3 = arith.constant 0 : index
    %8 = vector.load %arg1[%c16, %c0_3] : memref<304x128xbf16, #tpu.memory_space<vmem>>, vector<32x128xbf16>
    %c0_4 = arith.constant 0 : index
    %c0_5 = arith.constant 0 : index
    %9 = vector.load %arg1[%c0_4, %c0_5] : memref<304x128xbf16, #tpu.memory_space<vmem>>, vector<16x128xbf16>
    %cst = arith.constant dense<0.000000e+00> : vector<16x128xf32>
    %10 = tpu.matmul %7, %9, %cst {dimension_numbers = #tpu.dot_dimension_numbers<[1], [0], [0], [1], [0, 0, 1, 1], [], []>} : vector<16x16xbf16>, vector<16x128xbf16>, vector<16x128xf32> -> vector<16x128xf32>
    %11 = vector.extract_strided_slice %6 {offsets = [0, 0], sizes = [1, 128], strides = [1, 1]} : vector<5x128xf32> to vector<1x128xf32>
    %12 = vector.broadcast %11 : vector<1x128xf32> to vector<16x128xf32>
    %13 = arith.addf %10, %12 : vector<16x128xf32>
    %cst_6 = arith.constant 0.000000e+00 : f32
    %14 = vector.broadcast %cst_6 : f32 to vector<2x32xf32>
    %15 = vector.extract_strided_slice %13 {offsets = [0, 0], sizes = [2, 128], strides = [1, 1]} : vector<16x128xf32> to vector<2x128xf32>
    %cst_7 = arith.constant 5.000000e-01 : f32
    %16 = vector.broadcast %cst_7 : f32 to vector<2x128xf32>
    %17 = arith.mulf %16, %15 : vector<2x128xf32>
    %18 = arith.select %5, %15, %17 : vector<2x128xi1>, vector<2x128xf32>
    %19 = math.tanh %18 : vector<2x128xf32>
    %cst_8 = arith.constant 5.000000e-01 : f32
    %20 = vector.broadcast %cst_8 : f32 to vector<2x128xf32>
    %21 = arith.mulf %20, %19 : vector<2x128xf32>
    %cst_9 = arith.constant 5.000000e-01 : f32
    %22 = vector.broadcast %cst_9 : f32 to vector<2x128xf32>
    %23 = arith.addf %21, %22 : vector<2x128xf32>
    %24 = arith.select %5, %19, %23 : vector<2x128xi1>, vector<2x128xf32>
    %25 = vector.extract_strided_slice %24 {offsets = [0, 0], sizes = [2, 32], strides = [1, 1]} : vector<2x128xf32> to vector<2x32xf32>
    %26 = vector.extract_strided_slice %24 {offsets = [0, 32], sizes = [2, 32], strides = [1, 1]} : vector<2x128xf32> to vector<2x32xf32>
    %27 = vector.extract_strided_slice %24 {offsets = [0, 64], sizes = [2, 32], strides = [1, 1]} : vector<2x128xf32> to vector<2x32xf32>
    %28 = vector.extract_strided_slice %24 {offsets = [0, 96], sizes = [2, 32], strides = [1, 1]} : vector<2x128xf32> to vector<2x32xf32>
    %29 = arith.mulf %26, %14 : vector<2x32xf32>
    %30 = arith.mulf %25, %27 : vector<2x32xf32>
    %31 = arith.addf %29, %30 : vector<2x32xf32>
    %32 = math.tanh %31 : vector<2x32xf32>
    %33 = arith.mulf %28, %32 : vector<2x32xf32>
    %34 = vector.extract_strided_slice %13 {offsets = [2, 0], sizes = [2, 128], strides = [1, 1]} : vector<16x128xf32> to vector<2x128xf32>
    %35 = arith.truncf %33 : vector<2x32xf32> to vector<2x32xbf16>
    %cst_10 = arith.constant dense<0.000000e+00> : vector<2x128xf32>
    %36 = tpu.matmul %35, %8, %cst_10 {dimension_numbers = #tpu.dot_dimension_numbers<[1], [0], [0], [1], [0, 0, 1, 1], [], []>} : vector<2x32xbf16>, vector<32x128xbf16>, vector<2x128xf32> -> vector<2x128xf32>
    %37 = arith.addf %34, %36 : vector<2x128xf32>
    %cst_11 = arith.constant 5.000000e-01 : f32
    %38 = vector.broadcast %cst_11 : f32 to vector<2x128xf32>
    %39 = arith.mulf %38, %37 : vector<2x128xf32>
    %40 = arith.select %5, %37, %39 : vector<2x128xi1>, vector<2x128xf32>
    %41 = math.tanh %40 : vector<2x128xf32>
    %cst_12 = arith.constant 5.000000e-01 : f32
    %42 = vector.broadcast %cst_12 : f32 to vector<2x128xf32>
    %43 = arith.mulf %42, %41 : vector<2x128xf32>
    %cst_13 = arith.constant 5.000000e-01 : f32
    %44 = vector.broadcast %cst_13 : f32 to vector<2x128xf32>
    %45 = arith.addf %43, %44 : vector<2x128xf32>
    %46 = arith.select %5, %41, %45 : vector<2x128xi1>, vector<2x128xf32>
    %47 = vector.extract_strided_slice %46 {offsets = [0, 0], sizes = [2, 32], strides = [1, 1]} : vector<2x128xf32> to vector<2x32xf32>
    %48 = vector.extract_strided_slice %46 {offsets = [0, 32], sizes = [2, 32], strides = [1, 1]} : vector<2x128xf32> to vector<2x32xf32>
    %49 = vector.extract_strided_slice %46 {offsets = [0, 64], sizes = [2, 32], strides = [1, 1]} : vector<2x128xf32> to vector<2x32xf32>
    %50 = vector.extract_strided_slice %46 {offsets = [0, 96], sizes = [2, 32], strides = [1, 1]} : vector<2x128xf32> to vector<2x32xf32>
    %51 = arith.mulf %48, %31 : vector<2x32xf32>
    %52 = arith.mulf %47, %49 : vector<2x32xf32>
    %53 = arith.addf %51, %52 : vector<2x32xf32>
    %54 = math.tanh %53 : vector<2x32xf32>
    %55 = arith.mulf %50, %54 : vector<2x32xf32>
    %56 = vector.extract_strided_slice %13 {offsets = [4, 0], sizes = [2, 128], strides = [1, 1]} : vector<16x128xf32> to vector<2x128xf32>
    %57 = arith.truncf %55 : vector<2x32xf32> to vector<2x32xbf16>
    %cst_14 = arith.constant dense<0.000000e+00> : vector<2x128xf32>
    %58 = tpu.matmul %57, %8, %cst_14 {dimension_numbers = #tpu.dot_dimension_numbers<[1], [0], [0], [1], [0, 0, 1, 1], [], []>} : vector<2x32xbf16>, vector<32x128xbf16>, vector<2x128xf32> -> vector<2x128xf32>
    %59 = arith.addf %56, %58 : vector<2x128xf32>
    %cst_15 = arith.constant 5.000000e-01 : f32
    %60 = vector.broadcast %cst_15 : f32 to vector<2x128xf32>
    %61 = arith.mulf %60, %59 : vector<2x128xf32>
    %62 = arith.select %5, %59, %61 : vector<2x128xi1>, vector<2x128xf32>
    %63 = math.tanh %62 : vector<2x128xf32>
    %cst_16 = arith.constant 5.000000e-01 : f32
    %64 = vector.broadcast %cst_16 : f32 to vector<2x128xf32>
    %65 = arith.mulf %64, %63 : vector<2x128xf32>
    %cst_17 = arith.constant 5.000000e-01 : f32
    %66 = vector.broadcast %cst_17 : f32 to vector<2x128xf32>
    %67 = arith.addf %65, %66 : vector<2x128xf32>
    %68 = arith.select %5, %63, %67 : vector<2x128xi1>, vector<2x128xf32>
    %69 = vector.extract_strided_slice %68 {offsets = [0, 0], sizes = [2, 32], strides = [1, 1]} : vector<2x128xf32> to vector<2x32xf32>
    %70 = vector.extract_strided_slice %68 {offsets = [0, 32], sizes = [2, 32], strides = [1, 1]} : vector<2x128xf32> to vector<2x32xf32>
    %71 = vector.extract_strided_slice %68 {offsets = [0, 64], sizes = [2, 32], strides = [1, 1]} : vector<2x128xf32> to vector<2x32xf32>
    %72 = vector.extract_strided_slice %68 {offsets = [0, 96], sizes = [2, 32], strides = [1, 1]} : vector<2x128xf32> to vector<2x32xf32>
    %73 = arith.mulf %70, %53 : vector<2x32xf32>
    %74 = arith.mulf %69, %71 : vector<2x32xf32>
    %75 = arith.addf %73, %74 : vector<2x32xf32>
    %76 = math.tanh %75 : vector<2x32xf32>
    %77 = arith.mulf %72, %76 : vector<2x32xf32>
    %78 = vector.extract_strided_slice %13 {offsets = [6, 0], sizes = [2, 128], strides = [1, 1]} : vector<16x128xf32> to vector<2x128xf32>
    %79 = arith.truncf %77 : vector<2x32xf32> to vector<2x32xbf16>
    %cst_18 = arith.constant dense<0.000000e+00> : vector<2x128xf32>
    %80 = tpu.matmul %79, %8, %cst_18 {dimension_numbers = #tpu.dot_dimension_numbers<[1], [0], [0], [1], [0, 0, 1, 1], [], []>} : vector<2x32xbf16>, vector<32x128xbf16>, vector<2x128xf32> -> vector<2x128xf32>
    %81 = arith.addf %78, %80 : vector<2x128xf32>
    %cst_19 = arith.constant 5.000000e-01 : f32
    %82 = vector.broadcast %cst_19 : f32 to vector<2x128xf32>
    %83 = arith.mulf %82, %81 : vector<2x128xf32>
    %84 = arith.select %5, %81, %83 : vector<2x128xi1>, vector<2x128xf32>
    %85 = math.tanh %84 : vector<2x128xf32>
    %cst_20 = arith.constant 5.000000e-01 : f32
    %86 = vector.broadcast %cst_20 : f32 to vector<2x128xf32>
    %87 = arith.mulf %86, %85 : vector<2x128xf32>
    %cst_21 = arith.constant 5.000000e-01 : f32
    %88 = vector.broadcast %cst_21 : f32 to vector<2x128xf32>
    %89 = arith.addf %87, %88 : vector<2x128xf32>
    %90 = arith.select %5, %85, %89 : vector<2x128xi1>, vector<2x128xf32>
    %91 = vector.extract_strided_slice %90 {offsets = [0, 0], sizes = [2, 32], strides = [1, 1]} : vector<2x128xf32> to vector<2x32xf32>
    %92 = vector.extract_strided_slice %90 {offsets = [0, 32], sizes = [2, 32], strides = [1, 1]} : vector<2x128xf32> to vector<2x32xf32>
    %93 = vector.extract_strided_slice %90 {offsets = [0, 64], sizes = [2, 32], strides = [1, 1]} : vector<2x128xf32> to vector<2x32xf32>
    %94 = vector.extract_strided_slice %90 {offsets = [0, 96], sizes = [2, 32], strides = [1, 1]} : vector<2x128xf32> to vector<2x32xf32>
    %95 = arith.mulf %92, %75 : vector<2x32xf32>
    %96 = arith.mulf %91, %93 : vector<2x32xf32>
    %97 = arith.addf %95, %96 : vector<2x32xf32>
    %98 = math.tanh %97 : vector<2x32xf32>
    %99 = arith.mulf %94, %98 : vector<2x32xf32>
    %100 = vector.extract_strided_slice %13 {offsets = [8, 0], sizes = [2, 128], strides = [1, 1]} : vector<16x128xf32> to vector<2x128xf32>
    %101 = arith.truncf %99 : vector<2x32xf32> to vector<2x32xbf16>
    %cst_22 = arith.constant dense<0.000000e+00> : vector<2x128xf32>
    %102 = tpu.matmul %101, %8, %cst_22 {dimension_numbers = #tpu.dot_dimension_numbers<[1], [0], [0], [1], [0, 0, 1, 1], [], []>} : vector<2x32xbf16>, vector<32x128xbf16>, vector<2x128xf32> -> vector<2x128xf32>
    %103 = arith.addf %100, %102 : vector<2x128xf32>
    %cst_23 = arith.constant 5.000000e-01 : f32
    %104 = vector.broadcast %cst_23 : f32 to vector<2x128xf32>
    %105 = arith.mulf %104, %103 : vector<2x128xf32>
    %106 = arith.select %5, %103, %105 : vector<2x128xi1>, vector<2x128xf32>
    %107 = math.tanh %106 : vector<2x128xf32>
    %cst_24 = arith.constant 5.000000e-01 : f32
    %108 = vector.broadcast %cst_24 : f32 to vector<2x128xf32>
    %109 = arith.mulf %108, %107 : vector<2x128xf32>
    %cst_25 = arith.constant 5.000000e-01 : f32
    %110 = vector.broadcast %cst_25 : f32 to vector<2x128xf32>
    %111 = arith.addf %109, %110 : vector<2x128xf32>
    %112 = arith.select %5, %107, %111 : vector<2x128xi1>, vector<2x128xf32>
    %113 = vector.extract_strided_slice %112 {offsets = [0, 0], sizes = [2, 32], strides = [1, 1]} : vector<2x128xf32> to vector<2x32xf32>
    %114 = vector.extract_strided_slice %112 {offsets = [0, 32], sizes = [2, 32], strides = [1, 1]} : vector<2x128xf32> to vector<2x32xf32>
    %115 = vector.extract_strided_slice %112 {offsets = [0, 64], sizes = [2, 32], strides = [1, 1]} : vector<2x128xf32> to vector<2x32xf32>
    %116 = vector.extract_strided_slice %112 {offsets = [0, 96], sizes = [2, 32], strides = [1, 1]} : vector<2x128xf32> to vector<2x32xf32>
    %117 = arith.mulf %114, %97 : vector<2x32xf32>
    %118 = arith.mulf %113, %115 : vector<2x32xf32>
    %119 = arith.addf %117, %118 : vector<2x32xf32>
    %120 = math.tanh %119 : vector<2x32xf32>
    %121 = arith.mulf %116, %120 : vector<2x32xf32>
    %122 = vector.extract_strided_slice %13 {offsets = [10, 0], sizes = [2, 128], strides = [1, 1]} : vector<16x128xf32> to vector<2x128xf32>
    %123 = arith.truncf %121 : vector<2x32xf32> to vector<2x32xbf16>
    %cst_26 = arith.constant dense<0.000000e+00> : vector<2x128xf32>
    %124 = tpu.matmul %123, %8, %cst_26 {dimension_numbers = #tpu.dot_dimension_numbers<[1], [0], [0], [1], [0, 0, 1, 1], [], []>} : vector<2x32xbf16>, vector<32x128xbf16>, vector<2x128xf32> -> vector<2x128xf32>
    %125 = arith.addf %122, %124 : vector<2x128xf32>
    %cst_27 = arith.constant 5.000000e-01 : f32
    %126 = vector.broadcast %cst_27 : f32 to vector<2x128xf32>
    %127 = arith.mulf %126, %125 : vector<2x128xf32>
    %128 = arith.select %5, %125, %127 : vector<2x128xi1>, vector<2x128xf32>
    %129 = math.tanh %128 : vector<2x128xf32>
    %cst_28 = arith.constant 5.000000e-01 : f32
    %130 = vector.broadcast %cst_28 : f32 to vector<2x128xf32>
    %131 = arith.mulf %130, %129 : vector<2x128xf32>
    %cst_29 = arith.constant 5.000000e-01 : f32
    %132 = vector.broadcast %cst_29 : f32 to vector<2x128xf32>
    %133 = arith.addf %131, %132 : vector<2x128xf32>
    %134 = arith.select %5, %129, %133 : vector<2x128xi1>, vector<2x128xf32>
    %135 = vector.extract_strided_slice %134 {offsets = [0, 0], sizes = [2, 32], strides = [1, 1]} : vector<2x128xf32> to vector<2x32xf32>
    %136 = vector.extract_strided_slice %134 {offsets = [0, 32], sizes = [2, 32], strides = [1, 1]} : vector<2x128xf32> to vector<2x32xf32>
    %137 = vector.extract_strided_slice %134 {offsets = [0, 64], sizes = [2, 32], strides = [1, 1]} : vector<2x128xf32> to vector<2x32xf32>
    %138 = vector.extract_strided_slice %134 {offsets = [0, 96], sizes = [2, 32], strides = [1, 1]} : vector<2x128xf32> to vector<2x32xf32>
    %139 = arith.mulf %136, %119 : vector<2x32xf32>
    %140 = arith.mulf %135, %137 : vector<2x32xf32>
    %141 = arith.addf %139, %140 : vector<2x32xf32>
    %142 = math.tanh %141 : vector<2x32xf32>
    %143 = arith.mulf %138, %142 : vector<2x32xf32>
    %144 = vector.extract_strided_slice %13 {offsets = [12, 0], sizes = [2, 128], strides = [1, 1]} : vector<16x128xf32> to vector<2x128xf32>
    %145 = arith.truncf %143 : vector<2x32xf32> to vector<2x32xbf16>
    %cst_30 = arith.constant dense<0.000000e+00> : vector<2x128xf32>
    %146 = tpu.matmul %145, %8, %cst_30 {dimension_numbers = #tpu.dot_dimension_numbers<[1], [0], [0], [1], [0, 0, 1, 1], [], []>} : vector<2x32xbf16>, vector<32x128xbf16>, vector<2x128xf32> -> vector<2x128xf32>
    %147 = arith.addf %144, %146 : vector<2x128xf32>
    %cst_31 = arith.constant 5.000000e-01 : f32
    %148 = vector.broadcast %cst_31 : f32 to vector<2x128xf32>
    %149 = arith.mulf %148, %147 : vector<2x128xf32>
    %150 = arith.select %5, %147, %149 : vector<2x128xi1>, vector<2x128xf32>
    %151 = math.tanh %150 : vector<2x128xf32>
    %cst_32 = arith.constant 5.000000e-01 : f32
    %152 = vector.broadcast %cst_32 : f32 to vector<2x128xf32>
    %153 = arith.mulf %152, %151 : vector<2x128xf32>
    %cst_33 = arith.constant 5.000000e-01 : f32
    %154 = vector.broadcast %cst_33 : f32 to vector<2x128xf32>
    %155 = arith.addf %153, %154 : vector<2x128xf32>
    %156 = arith.select %5, %151, %155 : vector<2x128xi1>, vector<2x128xf32>
    %157 = vector.extract_strided_slice %156 {offsets = [0, 0], sizes = [2, 32], strides = [1, 1]} : vector<2x128xf32> to vector<2x32xf32>
    %158 = vector.extract_strided_slice %156 {offsets = [0, 32], sizes = [2, 32], strides = [1, 1]} : vector<2x128xf32> to vector<2x32xf32>
    %159 = vector.extract_strided_slice %156 {offsets = [0, 64], sizes = [2, 32], strides = [1, 1]} : vector<2x128xf32> to vector<2x32xf32>
    %160 = vector.extract_strided_slice %156 {offsets = [0, 96], sizes = [2, 32], strides = [1, 1]} : vector<2x128xf32> to vector<2x32xf32>
    %161 = arith.mulf %158, %141 : vector<2x32xf32>
    %162 = arith.mulf %157, %159 : vector<2x32xf32>
    %163 = arith.addf %161, %162 : vector<2x32xf32>
    %164 = math.tanh %163 : vector<2x32xf32>
    %165 = arith.mulf %160, %164 : vector<2x32xf32>
    %166 = vector.extract_strided_slice %13 {offsets = [14, 0], sizes = [2, 128], strides = [1, 1]} : vector<16x128xf32> to vector<2x128xf32>
    %167 = arith.truncf %165 : vector<2x32xf32> to vector<2x32xbf16>
    %cst_34 = arith.constant dense<0.000000e+00> : vector<2x128xf32>
    %168 = tpu.matmul %167, %8, %cst_34 {dimension_numbers = #tpu.dot_dimension_numbers<[1], [0], [0], [1], [0, 0, 1, 1], [], []>} : vector<2x32xbf16>, vector<32x128xbf16>, vector<2x128xf32> -> vector<2x128xf32>
    %169 = arith.addf %166, %168 : vector<2x128xf32>
    %cst_35 = arith.constant 5.000000e-01 : f32
    %170 = vector.broadcast %cst_35 : f32 to vector<2x128xf32>
    %171 = arith.mulf %170, %169 : vector<2x128xf32>
    %172 = arith.select %5, %169, %171 : vector<2x128xi1>, vector<2x128xf32>
    %173 = math.tanh %172 : vector<2x128xf32>
    %cst_36 = arith.constant 5.000000e-01 : f32
    %174 = vector.broadcast %cst_36 : f32 to vector<2x128xf32>
    %175 = arith.mulf %174, %173 : vector<2x128xf32>
    %cst_37 = arith.constant 5.000000e-01 : f32
    %176 = vector.broadcast %cst_37 : f32 to vector<2x128xf32>
    %177 = arith.addf %175, %176 : vector<2x128xf32>
    %178 = arith.select %5, %173, %177 : vector<2x128xi1>, vector<2x128xf32>
    %179 = vector.extract_strided_slice %178 {offsets = [0, 0], sizes = [2, 32], strides = [1, 1]} : vector<2x128xf32> to vector<2x32xf32>
    %180 = vector.extract_strided_slice %178 {offsets = [0, 32], sizes = [2, 32], strides = [1, 1]} : vector<2x128xf32> to vector<2x32xf32>
    %181 = vector.extract_strided_slice %178 {offsets = [0, 64], sizes = [2, 32], strides = [1, 1]} : vector<2x128xf32> to vector<2x32xf32>
    %182 = vector.extract_strided_slice %178 {offsets = [0, 96], sizes = [2, 32], strides = [1, 1]} : vector<2x128xf32> to vector<2x32xf32>
    %183 = arith.mulf %180, %163 : vector<2x32xf32>
    %184 = arith.mulf %179, %181 : vector<2x32xf32>
    %185 = arith.addf %183, %184 : vector<2x32xf32>
    %186 = math.tanh %185 : vector<2x32xf32>
    %187 = arith.mulf %182, %186 : vector<2x32xf32>
    %188 = tpu.concatenate %33, %55, %77, %99, %121, %143, %165, %187 in 0 : vector<2x32xf32>, vector<2x32xf32>, vector<2x32xf32>, vector<2x32xf32>, vector<2x32xf32>, vector<2x32xf32>, vector<2x32xf32>, vector<2x32xf32> -> vector<16x32xf32>
    %189 = arith.truncf %188 : vector<16x32xf32> to vector<16x32xbf16>
    %c144 = arith.constant 144 : index
    %c0_38 = arith.constant 0 : index
    %190 = vector.load %arg1[%c144, %c0_38] : memref<304x128xbf16, #tpu.memory_space<vmem>>, vector<32x128xbf16>
    %cst_39 = arith.constant dense<0.000000e+00> : vector<16x128xf32>
    %191 = tpu.matmul %189, %190, %cst_39 {dimension_numbers = #tpu.dot_dimension_numbers<[1], [0], [0], [1], [0, 0, 1, 1], [], []>} : vector<16x32xbf16>, vector<32x128xbf16>, vector<16x128xf32> -> vector<16x128xf32>
    %192 = vector.extract_strided_slice %6 {offsets = [3, 0], sizes = [1, 128], strides = [1, 1]} : vector<5x128xf32> to vector<1x128xf32>
    %193 = vector.broadcast %192 : vector<1x128xf32> to vector<16x128xf32>
    %194 = arith.addf %191, %193 : vector<16x128xf32>
    %cst_40 = arith.constant 0.000000e+00 : f32
    %195 = vector.broadcast %cst_40 : f32 to vector<16x128xf32>
    %196 = arith.maximumf %194, %195 : vector<16x128xf32>
    %197 = arith.truncf %196 : vector<16x128xf32> to vector<16x128xbf16>
    %c176 = arith.constant 176 : index
    %c0_41 = arith.constant 0 : index
    %198 = vector.load %arg1[%c176, %c0_41] : memref<304x128xbf16, #tpu.memory_space<vmem>>, vector<128x128xbf16>
    %cst_42 = arith.constant dense<0.000000e+00> : vector<16x128xf32>
    %199 = tpu.matmul %197, %198, %cst_42 {dimension_numbers = #tpu.dot_dimension_numbers<[1], [0], [0], [1], [0, 0, 1, 1], [], []>} : vector<16x128xbf16>, vector<128x128xbf16>, vector<16x128xf32> -> vector<16x128xf32>
    %200 = vector.extract_strided_slice %6 {offsets = [4, 0], sizes = [1, 128], strides = [1, 1]} : vector<5x128xf32> to vector<1x128xf32>
    %201 = vector.broadcast %200 : vector<1x128xf32> to vector<16x128xf32>
    %202 = arith.addf %199, %201 : vector<16x128xf32>
    %c0_43 = arith.constant 0 : index
    %c0_44 = arith.constant 0 : index
    %203 = vector.load %arg4[%c0_43, %c0_44] : memref<16x128xf32, #tpu.memory_space<vmem>>, vector<16x128xf32>
    tpu.vector_store %arg4[%c0_43, %c0_44], %202 {strides = array<i32>} : memref<16x128xf32, #tpu.memory_space<vmem>>, vector<16x128xf32>,
    %c80 = arith.constant 80 : index
    %c0_45 = arith.constant 0 : index
    %204 = vector.load %arg1[%c80, %c0_45] : memref<304x128xbf16, #tpu.memory_space<vmem>>, vector<32x128xbf16>
    %205 = arith.truncf %187 : vector<2x32xf32> to vector<2x32xbf16>
    %c48 = arith.constant 48 : index
    %c0_46 = arith.constant 0 : index
    %206 = vector.load %arg1[%c48, %c0_46] : memref<304x128xbf16, #tpu.memory_space<vmem>>, vector<32x128xbf16>
    %cst_47 = arith.constant dense<0.000000e+00> : vector<2x128xf32>
    %207 = tpu.matmul %205, %206, %cst_47 {dimension_numbers = #tpu.dot_dimension_numbers<[1], [0], [0], [1], [0, 0, 1, 1], [], []>} : vector<2x32xbf16>, vector<32x128xbf16>, vector<2x128xf32> -> vector<2x128xf32>
    %208 = vector.extract_strided_slice %6 {offsets = [1, 0], sizes = [1, 128], strides = [1, 1]} : vector<5x128xf32> to vector<1x128xf32>
    %209 = vector.broadcast %208 : vector<1x128xf32> to vector<2x128xf32>
    %210 = arith.addf %207, %209 : vector<2x128xf32>
    %cst_48 = arith.constant 0.000000e+00 : f32
    %211 = vector.broadcast %cst_48 : f32 to vector<2x32xf32>
    %cst_49 = arith.constant 5.000000e-01 : f32
    %212 = vector.broadcast %cst_49 : f32 to vector<2x128xf32>
    %213 = arith.mulf %212, %210 : vector<2x128xf32>
    %214 = arith.select %5, %210, %213 : vector<2x128xi1>, vector<2x128xf32>
    %215 = math.tanh %214 : vector<2x128xf32>
    %cst_50 = arith.constant 5.000000e-01 : f32
    %216 = vector.broadcast %cst_50 : f32 to vector<2x128xf32>
    %217 = arith.mulf %216, %215 : vector<2x128xf32>
    %cst_51 = arith.constant 5.000000e-01 : f32
    %218 = vector.broadcast %cst_51 : f32 to vector<2x128xf32>
    %219 = arith.addf %217, %218 : vector<2x128xf32>
    %220 = arith.select %5, %215, %219 : vector<2x128xi1>, vector<2x128xf32>
    %221 = vector.extract_strided_slice %220 {offsets = [0, 0], sizes = [2, 32], strides = [1, 1]} : vector<2x128xf32> to vector<2x32xf32>
    %222 = vector.extract_strided_slice %220 {offsets = [0, 32], sizes = [2, 32], strides = [1, 1]} : vector<2x128xf32> to vector<2x32xf32>
    %223 = vector.extract_strided_slice %220 {offsets = [0, 64], sizes = [2, 32], strides = [1, 1]} : vector<2x128xf32> to vector<2x32xf32>
    %224 = vector.extract_strided_slice %220 {offsets = [0, 96], sizes = [2, 32], strides = [1, 1]} : vector<2x128xf32> to vector<2x32xf32>
    %225 = arith.mulf %222, %211 : vector<2x32xf32>
    %226 = arith.mulf %221, %223 : vector<2x32xf32>
    %227 = arith.addf %225, %226 : vector<2x32xf32>
    %228 = math.tanh %227 : vector<2x32xf32>
    %229 = arith.mulf %224, %228 : vector<2x32xf32>
    %230 = arith.truncf %229 : vector<2x32xf32> to vector<2x32xbf16>
    %cst_52 = arith.constant dense<0.000000e+00> : vector<2x128xf32>
    %231 = tpu.matmul %230, %204, %cst_52 {dimension_numbers = #tpu.dot_dimension_numbers<[1], [0], [0], [1], [0, 0, 1, 1], [], []>} : vector<2x32xbf16>, vector<32x128xbf16>, vector<2x128xf32> -> vector<2x128xf32>
    %232 = arith.addf %210, %231 : vector<2x128xf32>
    %cst_53 = arith.constant 5.000000e-01 : f32
    %233 = vector.broadcast %cst_53 : f32 to vector<2x128xf32>
    %234 = arith.mulf %233, %232 : vector<2x128xf32>
    %235 = arith.select %5, %232, %234 : vector<2x128xi1>, vector<2x128xf32>
    %236 = math.tanh %235 : vector<2x128xf32>
    %cst_54 = arith.constant 5.000000e-01 : f32
    %237 = vector.broadcast %cst_54 : f32 to vector<2x128xf32>
    %238 = arith.mulf %237, %236 : vector<2x128xf32>
    %cst_55 = arith.constant 5.000000e-01 : f32
    %239 = vector.broadcast %cst_55 : f32 to vector<2x128xf32>
    %240 = arith.addf %238, %239 : vector<2x128xf32>
    %241 = arith.select %5, %236, %240 : vector<2x128xi1>, vector<2x128xf32>
    %242 = vector.extract_strided_slice %241 {offsets = [0, 0], sizes = [2, 32], strides = [1, 1]} : vector<2x128xf32> to vector<2x32xf32>
    %243 = vector.extract_strided_slice %241 {offsets = [0, 32], sizes = [2, 32], strides = [1, 1]} : vector<2x128xf32> to vector<2x32xf32>
    %244 = vector.extract_strided_slice %241 {offsets = [0, 64], sizes = [2, 32], strides = [1, 1]} : vector<2x128xf32> to vector<2x32xf32>
    %245 = vector.extract_strided_slice %241 {offsets = [0, 96], sizes = [2, 32], strides = [1, 1]} : vector<2x128xf32> to vector<2x32xf32>
    %246 = arith.mulf %243, %227 : vector<2x32xf32>
    %247 = arith.mulf %242, %244 : vector<2x32xf32>
    %248 = arith.addf %246, %247 : vector<2x32xf32>
    %249 = math.tanh %248 : vector<2x32xf32>
    %250 = arith.mulf %245, %249 : vector<2x32xf32>
    %251 = arith.truncf %250 : vector<2x32xf32> to vector<2x32xbf16>
    %cst_56 = arith.constant dense<0.000000e+00> : vector<2x128xf32>
    %252 = tpu.matmul %251, %204, %cst_56 {dimension_numbers = #tpu.dot_dimension_numbers<[1], [0], [0], [1], [0, 0, 1, 1], [], []>} : vector<2x32xbf16>, vector<32x128xbf16>, vector<2x128xf32> -> vector<2x128xf32>
    %253 = arith.addf %210, %252 : vector<2x128xf32>
    %cst_57 = arith.constant 5.000000e-01 : f32
    %254 = vector.broadcast %cst_57 : f32 to vector<2x128xf32>
    %255 = arith.mulf %254, %253 : vector<2x128xf32>
    %256 = arith.select %5, %253, %255 : vector<2x128xi1>, vector<2x128xf32>
    %257 = math.tanh %256 : vector<2x128xf32>
    %cst_58 = arith.constant 5.000000e-01 : f32
    %258 = vector.broadcast %cst_58 : f32 to vector<2x128xf32>
    %259 = arith.mulf %258, %257 : vector<2x128xf32>
    %cst_59 = arith.constant 5.000000e-01 : f32
    %260 = vector.broadcast %cst_59 : f32 to vector<2x128xf32>
    %261 = arith.addf %259, %260 : vector<2x128xf32>
    %262 = arith.select %5, %257, %261 : vector<2x128xi1>, vector<2x128xf32>
    %263 = vector.extract_strided_slice %262 {offsets = [0, 0], sizes = [2, 32], strides = [1, 1]} : vector<2x128xf32> to vector<2x32xf32>
    %264 = vector.extract_strided_slice %262 {offsets = [0, 32], sizes = [2, 32], strides = [1, 1]} : vector<2x128xf32> to vector<2x32xf32>
    %265 = vector.extract_strided_slice %262 {offsets = [0, 64], sizes = [2, 32], strides = [1, 1]} : vector<2x128xf32> to vector<2x32xf32>
    %266 = vector.extract_strided_slice %262 {offsets = [0, 96], sizes = [2, 32], strides = [1, 1]} : vector<2x128xf32> to vector<2x32xf32>
    %267 = arith.mulf %264, %248 : vector<2x32xf32>
    %268 = arith.mulf %263, %265 : vector<2x32xf32>
    %269 = arith.addf %267, %268 : vector<2x32xf32>
    %270 = math.tanh %269 : vector<2x32xf32>
    %271 = arith.mulf %266, %270 : vector<2x32xf32>
    %272 = arith.truncf %271 : vector<2x32xf32> to vector<2x32xbf16>
    %cst_60 = arith.constant dense<0.000000e+00> : vector<2x128xf32>
    %273 = tpu.matmul %272, %204, %cst_60 {dimension_numbers = #tpu.dot_dimension_numbers<[1], [0], [0], [1], [0, 0, 1, 1], [], []>} : vector<2x32xbf16>, vector<32x128xbf16>, vector<2x128xf32> -> vector<2x128xf32>
    %274 = arith.addf %210, %273 : vector<2x128xf32>
    %cst_61 = arith.constant 5.000000e-01 : f32
    %275 = vector.broadcast %cst_61 : f32 to vector<2x128xf32>
    %276 = arith.mulf %275, %274 : vector<2x128xf32>
    %277 = arith.select %5, %274, %276 : vector<2x128xi1>, vector<2x128xf32>
    %278 = math.tanh %277 : vector<2x128xf32>
    %cst_62 = arith.constant 5.000000e-01 : f32
    %279 = vector.broadcast %cst_62 : f32 to vector<2x128xf32>
    %280 = arith.mulf %279, %278 : vector<2x128xf32>
    %cst_63 = arith.constant 5.000000e-01 : f32
    %281 = vector.broadcast %cst_63 : f32 to vector<2x128xf32>
    %282 = arith.addf %280, %281 : vector<2x128xf32>
    %283 = arith.select %5, %278, %282 : vector<2x128xi1>, vector<2x128xf32>
    %284 = vector.extract_strided_slice %283 {offsets = [0, 0], sizes = [2, 32], strides = [1, 1]} : vector<2x128xf32> to vector<2x32xf32>
    %285 = vector.extract_strided_slice %283 {offsets = [0, 32], sizes = [2, 32], strides = [1, 1]} : vector<2x128xf32> to vector<2x32xf32>
    %286 = vector.extract_strided_slice %283 {offsets = [0, 64], sizes = [2, 32], strides = [1, 1]} : vector<2x128xf32> to vector<2x32xf32>
    %287 = vector.extract_strided_slice %283 {offsets = [0, 96], sizes = [2, 32], strides = [1, 1]} : vector<2x128xf32> to vector<2x32xf32>
    %288 = arith.mulf %285, %269 : vector<2x32xf32>
    %289 = arith.mulf %284, %286 : vector<2x32xf32>
    %290 = arith.addf %288, %289 : vector<2x32xf32>
    %291 = math.tanh %290 : vector<2x32xf32>
    %292 = arith.mulf %287, %291 : vector<2x32xf32>
    %293 = arith.truncf %292 : vector<2x32xf32> to vector<2x32xbf16>
    %cst_64 = arith.constant dense<0.000000e+00> : vector<2x128xf32>
    %294 = tpu.matmul %293, %204, %cst_64 {dimension_numbers = #tpu.dot_dimension_numbers<[1], [0], [0], [1], [0, 0, 1, 1], [], []>} : vector<2x32xbf16>, vector<32x128xbf16>, vector<2x128xf32> -> vector<2x128xf32>
    %295 = arith.addf %210, %294 : vector<2x128xf32>
    %cst_65 = arith.constant 5.000000e-01 : f32
    %296 = vector.broadcast %cst_65 : f32 to vector<2x128xf32>
    %297 = arith.mulf %296, %295 : vector<2x128xf32>
    %298 = arith.select %5, %295, %297 : vector<2x128xi1>, vector<2x128xf32>
    %299 = math.tanh %298 : vector<2x128xf32>
    %cst_66 = arith.constant 5.000000e-01 : f32
    %300 = vector.broadcast %cst_66 : f32 to vector<2x128xf32>
    %301 = arith.mulf %300, %299 : vector<2x128xf32>
    %cst_67 = arith.constant 5.000000e-01 : f32
    %302 = vector.broadcast %cst_67 : f32 to vector<2x128xf32>
    %303 = arith.addf %301, %302 : vector<2x128xf32>
    %304 = arith.select %5, %299, %303 : vector<2x128xi1>, vector<2x128xf32>
    %305 = vector.extract_strided_slice %304 {offsets = [0, 0], sizes = [2, 32], strides = [1, 1]} : vector<2x128xf32> to vector<2x32xf32>
    %306 = vector.extract_strided_slice %304 {offsets = [0, 32], sizes = [2, 32], strides = [1, 1]} : vector<2x128xf32> to vector<2x32xf32>
    %307 = vector.extract_strided_slice %304 {offsets = [0, 64], sizes = [2, 32], strides = [1, 1]} : vector<2x128xf32> to vector<2x32xf32>
    %308 = vector.extract_strided_slice %304 {offsets = [0, 96], sizes = [2, 32], strides = [1, 1]} : vector<2x128xf32> to vector<2x32xf32>
    %309 = arith.mulf %306, %290 : vector<2x32xf32>
    %310 = arith.mulf %305, %307 : vector<2x32xf32>
    %311 = arith.addf %309, %310 : vector<2x32xf32>
    %312 = math.tanh %311 : vector<2x32xf32>
    %313 = arith.mulf %308, %312 : vector<2x32xf32>
    %314 = arith.truncf %313 : vector<2x32xf32> to vector<2x32xbf16>
    %cst_68 = arith.constant dense<0.000000e+00> : vector<2x128xf32>
    %315 = tpu.matmul %314, %204, %cst_68 {dimension_numbers = #tpu.dot_dimension_numbers<[1], [0], [0], [1], [0, 0, 1, 1], [], []>} : vector<2x32xbf16>, vector<32x128xbf16>, vector<2x128xf32> -> vector<2x128xf32>
    %316 = arith.addf %210, %315 : vector<2x128xf32>
    %cst_69 = arith.constant 5.000000e-01 : f32
    %317 = vector.broadcast %cst_69 : f32 to vector<2x128xf32>
    %318 = arith.mulf %317, %316 : vector<2x128xf32>
    %319 = arith.select %5, %316, %318 : vector<2x128xi1>, vector<2x128xf32>
    %320 = math.tanh %319 : vector<2x128xf32>
    %cst_70 = arith.constant 5.000000e-01 : f32
    %321 = vector.broadcast %cst_70 : f32 to vector<2x128xf32>
    %322 = arith.mulf %321, %320 : vector<2x128xf32>
    %cst_71 = arith.constant 5.000000e-01 : f32
    %323 = vector.broadcast %cst_71 : f32 to vector<2x128xf32>
    %324 = arith.addf %322, %323 : vector<2x128xf32>
    %325 = arith.select %5, %320, %324 : vector<2x128xi1>, vector<2x128xf32>
    %326 = vector.extract_strided_slice %325 {offsets = [0, 0], sizes = [2, 32], strides = [1, 1]} : vector<2x128xf32> to vector<2x32xf32>
    %327 = vector.extract_strided_slice %325 {offsets = [0, 32], sizes = [2, 32], strides = [1, 1]} : vector<2x128xf32> to vector<2x32xf32>
    %328 = vector.extract_strided_slice %325 {offsets = [0, 64], sizes = [2, 32], strides = [1, 1]} : vector<2x128xf32> to vector<2x32xf32>
    %329 = vector.extract_strided_slice %325 {offsets = [0, 96], sizes = [2, 32], strides = [1, 1]} : vector<2x128xf32> to vector<2x32xf32>
    %330 = arith.mulf %327, %311 : vector<2x32xf32>
    %331 = arith.mulf %326, %328 : vector<2x32xf32>
    %332 = arith.addf %330, %331 : vector<2x32xf32>
    %333 = math.tanh %332 : vector<2x32xf32>
    %334 = arith.mulf %329, %333 : vector<2x32xf32>
    %335 = arith.truncf %334 : vector<2x32xf32> to vector<2x32xbf16>
    %cst_72 = arith.constant dense<0.000000e+00> : vector<2x128xf32>
    %336 = tpu.matmul %335, %204, %cst_72 {dimension_numbers = #tpu.dot_dimension_numbers<[1], [0], [0], [1], [0, 0, 1, 1], [], []>} : vector<2x32xbf16>, vector<32x128xbf16>, vector<2x128xf32> -> vector<2x128xf32>
    %337 = arith.addf %210, %336 : vector<2x128xf32>
    %cst_73 = arith.constant 5.000000e-01 : f32
    %338 = vector.broadcast %cst_73 : f32 to vector<2x128xf32>
    %339 = arith.mulf %338, %337 : vector<2x128xf32>
    %340 = arith.select %5, %337, %339 : vector<2x128xi1>, vector<2x128xf32>
    %341 = math.tanh %340 : vector<2x128xf32>
    %cst_74 = arith.constant 5.000000e-01 : f32
    %342 = vector.broadcast %cst_74 : f32 to vector<2x128xf32>
    %343 = arith.mulf %342, %341 : vector<2x128xf32>
    %cst_75 = arith.constant 5.000000e-01 : f32
    %344 = vector.broadcast %cst_75 : f32 to vector<2x128xf32>
    %345 = arith.addf %343, %344 : vector<2x128xf32>
    %346 = arith.select %5, %341, %345 : vector<2x128xi1>, vector<2x128xf32>
    %347 = vector.extract_strided_slice %346 {offsets = [0, 0], sizes = [2, 32], strides = [1, 1]} : vector<2x128xf32> to vector<2x32xf32>
    %348 = vector.extract_strided_slice %346 {offsets = [0, 32], sizes = [2, 32], strides = [1, 1]} : vector<2x128xf32> to vector<2x32xf32>
    %349 = vector.extract_strided_slice %346 {offsets = [0, 64], sizes = [2, 32], strides = [1, 1]} : vector<2x128xf32> to vector<2x32xf32>
    %350 = vector.extract_strided_slice %346 {offsets = [0, 96], sizes = [2, 32], strides = [1, 1]} : vector<2x128xf32> to vector<2x32xf32>
    %351 = arith.mulf %348, %332 : vector<2x32xf32>
    %352 = arith.mulf %347, %349 : vector<2x32xf32>
    %353 = arith.addf %351, %352 : vector<2x32xf32>
    %354 = math.tanh %353 : vector<2x32xf32>
    %355 = arith.mulf %350, %354 : vector<2x32xf32>
    %356 = arith.truncf %355 : vector<2x32xf32> to vector<2x32xbf16>
    %cst_76 = arith.constant dense<0.000000e+00> : vector<2x128xf32>
    %357 = tpu.matmul %356, %204, %cst_76 {dimension_numbers = #tpu.dot_dimension_numbers<[1], [0], [0], [1], [0, 0, 1, 1], [], []>} : vector<2x32xbf16>, vector<32x128xbf16>, vector<2x128xf32> -> vector<2x128xf32>
    %358 = arith.addf %210, %357 : vector<2x128xf32>
    %cst_77 = arith.constant 5.000000e-01 : f32
    %359 = vector.broadcast %cst_77 : f32 to vector<2x128xf32>
    %360 = arith.mulf %359, %358 : vector<2x128xf32>
    %361 = arith.select %5, %358, %360 : vector<2x128xi1>, vector<2x128xf32>
    %362 = math.tanh %361 : vector<2x128xf32>
    %cst_78 = arith.constant 5.000000e-01 : f32
    %363 = vector.broadcast %cst_78 : f32 to vector<2x128xf32>
    %364 = arith.mulf %363, %362 : vector<2x128xf32>
    %cst_79 = arith.constant 5.000000e-01 : f32
    %365 = vector.broadcast %cst_79 : f32 to vector<2x128xf32>
    %366 = arith.addf %364, %365 : vector<2x128xf32>
    %367 = arith.select %5, %362, %366 : vector<2x128xi1>, vector<2x128xf32>
    %368 = vector.extract_strided_slice %367 {offsets = [0, 0], sizes = [2, 32], strides = [1, 1]} : vector<2x128xf32> to vector<2x32xf32>
    %369 = vector.extract_strided_slice %367 {offsets = [0, 32], sizes = [2, 32], strides = [1, 1]} : vector<2x128xf32> to vector<2x32xf32>
    %370 = vector.extract_strided_slice %367 {offsets = [0, 64], sizes = [2, 32], strides = [1, 1]} : vector<2x128xf32> to vector<2x32xf32>
    %371 = vector.extract_strided_slice %367 {offsets = [0, 96], sizes = [2, 32], strides = [1, 1]} : vector<2x128xf32> to vector<2x32xf32>
    %372 = arith.mulf %369, %353 : vector<2x32xf32>
    %373 = arith.mulf %368, %370 : vector<2x32xf32>
    %374 = arith.addf %372, %373 : vector<2x32xf32>
    %375 = math.tanh %374 : vector<2x32xf32>
    %376 = arith.mulf %371, %375 : vector<2x32xf32>
    %377 = tpu.concatenate %229, %250, %271, %292, %313, %334, %355, %376 in 0 : vector<2x32xf32>, vector<2x32xf32>, vector<2x32xf32>, vector<2x32xf32>, vector<2x32xf32>, vector<2x32xf32>, vector<2x32xf32>, vector<2x32xf32> -> vector<16x32xf32>
    %378 = arith.truncf %377 : vector<16x32xf32> to vector<16x32xbf16>
    %c112 = arith.constant 112 : index
    %c0_80 = arith.constant 0 : index
    %379 = vector.load %arg1[%c112, %c0_80] : memref<304x128xbf16, #tpu.memory_space<vmem>>, vector<32x128xbf16>
    %cst_81 = arith.constant dense<0.000000e+00> : vector<16x128xf32>
    %380 = tpu.matmul %378, %379, %cst_81 {dimension_numbers = #tpu.dot_dimension_numbers<[1], [0], [0], [1], [0, 0, 1, 1], [], []>} : vector<16x32xbf16>, vector<32x128xbf16>, vector<16x128xf32> -> vector<16x128xf32>
    %381 = vector.extract_strided_slice %6 {offsets = [2, 0], sizes = [1, 128], strides = [1, 1]} : vector<5x128xf32> to vector<1x128xf32>
    %382 = vector.broadcast %381 : vector<1x128xf32> to vector<16x128xf32>
    %383 = arith.addf %380, %382 : vector<16x128xf32>
    %c0_82 = arith.constant 0 : index
    %c0_83 = arith.constant 0 : index
    %384 = vector.load %arg3[%c0_82, %c0_83] : memref<16x128xf32, #tpu.memory_space<vmem>>, vector<16x128xf32>
    tpu.vector_store %arg3[%c0_82, %c0_83], %383 {strides = array<i32>} : memref<16x128xf32, #tpu.memory_space<vmem>>, vector<16x128xf32>,
    return
  }
}

</mosaic_0001>

<bundles_post_ra>
// kernel: lstm_autoencoder_forward.1
= control target key start
LH: loop header
LB: loop body
LE: loop exit
PB: predicated region body
PF: predicated region fallthrough
CT: control target
= control target key end

     0   :  { %v1916_v0 = vmov 0.0   ;;  %vm1917_vm0 = vmmov 0   ;;  %vm46_vm1 = vcmask 130048   ;;  %v17_v3 = vlaneseq  ;;  %s1918_s20 = smov 64   ;;  %s1919_s21 = smov 32   ;;  %s2365_s1 = inlined_call_operand.vmem [shape: bf16[304,128], index: 1, kind: input, shape index: {}]   ;;  %s2366_s0 = inlined_call_operand.vmem [shape: bf16[16,16], index: 0, kind: input, shape index: {}]   ;;  %s2367_s2 = inlined_call_operand.vmem [shape: f32[5,128], index: 2, kind: input, shape index: {}]   ;;  %s2368_s4 = inlined_call_operand.vmem [shape: f32[16,128], index: 4, kind: output, shape index: {1}]   ;;  %s2369_s3 = inlined_call_operand.vmem [shape: f32[16,128], index: 3, kind: output, shape index: {0}]  }
   0x1   :  { %1665 = vmatprep.subr.bf16.mxu0 %v1916_v0  ;;  %v1831_v1 = vld [vmem:[%s2365_s1] sm:$0xff]   ;;  %1667 = vmatprep.mubr.msk.bf16.mxu0 %vm1917_vm0, %v1916_v0  ;;  %v1988_v27 = vld [vmem:[%s2365_s1 + $0x8] sm:$0xff]   ;;  %v1994_v28 = vld [vmem:[%s2365_s1 + $0x10] sm:$0xff]   ;;  %vm130_vm5 = vcmask 261120   ;;  %vm668_vm6 = vcmask 1041408   ;;  %vm670_vm7 = vcmask 1043456  }
   0x2   :  { %v1832_v2 = vld [vmem:[%s2366_s0] sm:$0xff]   ;;  %1671 = vmatprep.subr.bf16.mxu1 %v1916_v0  ;;  %1675 = vmatprep.mubr.msk.bf16.mxu1 %vm1917_vm0, %v1916_v0  ;;  %v1960_v4 = vshrl.u32 %v17_v3, 7  ;;  %v18_v7 = vand.u32 127, %v17_v3  ;;  %vm672_vm8 = vcmask 1045504  }
   0x3   :  { %1666 = vmatpush3.bf16.msra.mxu0 %v1831_v1  ;;  %v1966_v6 = vld [vmem:[%s2367_s2] sm:$0x1f]  ;;  %1672 = vmatpush3.bf16.msra.mxu1 %v1988_v27 }
   0x4   :  { %1679 = vmatprep.subr.bf16.mxu0 %v1916_v0  ;;  %v33_v5 = vsub.s32 0, %v1960_v4  ;;  %vm19_vm2 = vcmp.ge.s32.totalorder %v18_v7, 64  ;;  %vm20_vm3 = vcmp.lt.s32.totalorder %v18_v7, 96  ;;  %1673 = vmatprep.subr.bf16.mxu1 %v1916_v0  ;;  %v1850_v12 = vld [vmem:[%s2365_s1 + $0x40] sm:$0xff]  }
   0x5   :  { %vm1971_vm4 = vmand %vm19_vm2, %vm20_vm3 }
   0x6   :  { %1668 = vmatmul.mubr.msk.bf16.vlgmr.msra.gmra.mrb[0].mxu0 %vm46_vm1, %v1832_v2  ;;  %v34_v8 = vrot.slane %v1966_v6, %v33_v5 }
   0x7   :  { %1683 = vmatprep.mubr.msk.bf16.mxu0 %vm1917_vm0, %v1916_v0  ;;  %1680 = vmatpush3.bf16.msra.mxu0 %v1988_v27 }
   0x8   :  { %1681 = vmatprep.subr.bf16.mxu0 %v1916_v0  ;;  %1674 = vmatpush3.bf16.msra.mxu1 %v1994_v28 }
   0x9   :  { %1687 = vmatprep.subr.bf16.mxu1 %v1916_v0 }
   0xb   :  { %1682 = vmatpush3.bf16.msra.mxu0 %v1994_v28 }
   0xc   :  { %1695 = vmatprep.subr.bf16.mxu0 %v1916_v0 }
  0xd9   :  { %v84_v9 = vpop.f32.mrb[0].mxu0 }
  0xda   :  { %v1969_v10 = vadd.f32 %v84_v9, %v34_v8  ;;  %v1669_v11 = vpop.f32.mrb[1].mxu0 }
  0xdb   :  { %v87_v13 = vpop.f32.mrb[2].mxu0 }
  0xdc   :  { %v91_v14 = vmul.f32 0.5, %v1969_v10  ;;  %v1976_v15 = vadd.f32 %v87_v13, %v34_v8  ;;  %v1670_v16 = vpop.f32.mrb[3].mxu0 }
  0xde   :  { %v92_v17 = vsel %vm1971_vm4, %v1969_v10, %v91_v14 }
  0xdf   :  { %1851 = vtanh.f32 %v92_v17 }
  0xe9   :  { %v1852_v18 = vpop.eup %1851 }
  0xea   :  { %v94_v19 = vmul.f32 0.5, %v1852_v18 }
  0xec   :  { %v95_v20 = vadd.f32 0.5, %v94_v19 }
  0xee   :  { %v96_v21 = vsel %vm1971_vm4, %v1852_v18, %v95_v20 }
  0xef   :  { %99 = vrot.lane.b32.xlu0 %v96_v21, %s1918_s20  ;;  %v97_v24 = vmul.f32 0.0, %v96_v21 }
 0x161   :  { %v100_v22 = vpop.permute.xlu0 %99 }
 0x162   :  { %v102_v23 = vmul.f32 %v100_v22, %v96_v21 }
 0x164   :  { %104 = vrot.lane.b32.xlu0 %v102_v23, %s1919_s21 }
 0x1d6   :  { %v105_v25 = vpop.permute.xlu0 %104 }
 0x1d7   :  { %v107_v26 = vadd.f32 %v105_v25, %v97_v24 }
 0x1d9   :  { %1853 = vtanh.f32 %v107_v26  ;;  %v185_v48 = vrot.slane %v107_v26, 6 }
 0x1e3   :  { %v1854_v29 = vpop.eup %1853 }
 0x1e4   :  { %110 = vrot.lane.b32.xlu1 %v1854_v29, %s1918_s20 }
 0x256   :  { %v111_v30 = vpop.permute.xlu1 %110 }
 0x257   :  { %v2004_v31 = vmul.f32 %v111_v30, %v96_v21 }
 0x259   :  { %v114_v32 = vpack.c.bf16 %v2004_v31, %v2004_v31 }
 0x25b   :  { %116 = vrot.lane.b32.xlu1 %v114_v32, %s1919_s21 }
 0x2cd   :  { %v117_v33 = vpop.permute.xlu1 %116 }
 0x2ce   :  { %1676 = vmatmul.mubr.msk.bf16.vlgmr.msra.gmra.mrb[0].mxu1 %vm130_vm5, %v117_v33 }
 0x2cf   :  { %1688 = vmatpush3.bf16.msra.mxu1 %v1988_v27  ;;  %1691 = vmatprep.mubr.msk.bf16.mxu1 %vm1917_vm0, %v1916_v0 }
 0x2d0   :  { %1689 = vmatprep.subr.bf16.mxu1 %v1916_v0 }
 0x2d3   :  { %1690 = vmatpush3.bf16.msra.mxu1 %v1994_v28 }
 0x2d4   :  { %1703 = vmatprep.subr.bf16.mxu1 %v1916_v0 }
 0x3a1   :  { %v168_v34 = vpop.f32.mrb[0].mxu1 }
 0x3a2   :  { %v175_v35 = vrot.slane %v168_v34, 6  ;;  %v1677_v36 = vpop.f32.mrb[1].mxu1 }
 0x3a3   :  { %v171_v37 = vpop.f32.mrb[2].mxu1 }
 0x3a4   :  { %v177_v38 = vadd.f32 %v175_v35, %v1969_v10  ;;  %v1678_v39 = vpop.f32.mrb[3].mxu1 }
 0x3a6   :  { %v178_v40 = vmul.f32 0.5, %v177_v38 }
 0x3a8   :  { %v179_v41 = vsel %vm1971_vm4, %v177_v38, %v178_v40 }
 0x3a9   :  { %1855 = vtanh.f32 %v179_v41 }
 0x3b3   :  { %v1856_v42 = vpop.eup %1855 }
 0x3b4   :  { %v181_v43 = vmul.f32 0.5, %v1856_v42 }
 0x3b6   :  { %v182_v44 = vadd.f32 0.5, %v181_v43 }
 0x3b8   :  { %v183_v45 = vsel %vm1971_vm4, %v1856_v42, %v182_v44 }
 0x3b9   :  { %189 = vrot.lane.b32.xlu0 %v183_v45, %s1918_s20  ;;  %v187_v49 = vmul.f32 %v185_v48, %v183_v45 }
 0x42b   :  { %v190_v46 = vpop.permute.xlu0 %189 }
 0x42c   :  { %v192_v47 = vmul.f32 %v190_v46, %v183_v45 }
 0x42e   :  { %194 = vrot.lane.b32.xlu1 %v192_v47, %s1919_s21 }
 0x4a0   :  { %v195_v50 = vpop.permute.xlu1 %194 }
 0x4a1   :  { %v197_v51 = vadd.f32 %v195_v50, %v187_v49 }
 0x4a3   :  { %1857 = vtanh.f32 %v197_v51  ;;  %v263_v13 = vrot.slane %v197_v51, 6 }
 0x4ad   :  { %v1858_v52 = vpop.eup %1857 }
 0x4ae   :  { %200 = vrot.lane.b32.xlu0 %v1858_v52, %s1918_s20 }
 0x520   :  { %v201_v53 = vpop.permute.xlu0 %200 }
 0x521   :  { %v203_v54 = vmul.f32 %v201_v53, %v183_v45 }
 0x523   :  { %v204_v55 = vpack.c.bf16 %v203_v54, %v203_v54  ;;  %v669_v21 = vsel %vm668_vm6, %v2004_v31, %v203_v54 }
 0x525   :  { %v206_v56 = vrot.slane %v204_v55, 1 }
 0x527   :  { %207 = vrot.lane.b32.xlu1 %v206_v56, %s1919_s21 }
 0x599   :  { %v208_v57 = vpop.permute.xlu1 %207 }
 0x59a   :  { %1684 = vmatmul.mubr.msk.bf16.vlgmr.msra.gmra.mrb[4].mxu0 %vm130_vm5, %v208_v57 }
 0x59b   :  { %1696 = vmatpush3.bf16.msra.mxu0 %v1988_v27  ;;  %1699 = vmatprep.mubr.msk.bf16.mxu0 %vm1917_vm0, %v1916_v0 }
 0x59c   :  { %1697 = vmatprep.subr.bf16.mxu0 %v1916_v0 }
 0x59f   :  { %1698 = vmatpush3.bf16.msra.mxu0 %v1994_v28 }
 0x5a0   :  { %1711 = vmatprep.subr.bf16.mxu0 %v1916_v0 }
 0x66d   :  { %v246_v58 = vpop.f32.mrb[4].mxu0 }
 0x66e   :  { %v253_v59 = vrot.slane %v246_v58, 4  ;;  %v1685_v60 = vpop.f32.mrb[5].mxu0 }
 0x66f   :  { %v249_v61 = vpop.f32.mrb[6].mxu0 }
 0x670   :  { %v255_v62 = vadd.f32 %v253_v59, %v1969_v10  ;;  %v1686_v63 = vpop.f32.mrb[7].mxu0 }
 0x672   :  { %v256_v1 = vmul.f32 0.5, %v255_v62 }
 0x674   :  { %v257_v2 = vsel %vm1971_vm4, %v255_v62, %v256_v1 }
 0x675   :  { %1859 = vtanh.f32 %v257_v2 }
 0x67f   :  { %v1860_v3 = vpop.eup %1859 }
 0x680   :  { %v259_v5 = vmul.f32 0.5, %v1860_v3 }
 0x682   :  { %v260_v7 = vadd.f32 0.5, %v259_v5 }
 0x684   :  { %v261_v8 = vsel %vm1971_vm4, %v1860_v3, %v260_v7 }
 0x685   :  { %267 = vrot.lane.b32.xlu0 %v261_v8, %s1918_s20  ;;  %v265_v14 = vmul.f32 %v263_v13, %v261_v8 }
 0x6f7   :  { %v268_v9 = vpop.permute.xlu0 %267 }
 0x6f8   :  { %v270_v11 = vmul.f32 %v268_v9, %v261_v8 }
 0x6fa   :  { %272 = vrot.lane.b32.xlu1 %v270_v11, %s1919_s21 }
 0x76c   :  { %v273_v16 = vpop.permute.xlu1 %272 }
 0x76d   :  { %v275_v17 = vadd.f32 %v273_v16, %v265_v14 }
 0x76f   :  { %1861 = vtanh.f32 %v275_v17  ;;  %v341_v42 = vrot.slane %v275_v17, 6 }
 0x779   :  { %v1862_v18 = vpop.eup %1861 }
 0x77a   :  { %278 = vrot.lane.b32.xlu0 %v1862_v18, %s1918_s20 }
 0x7ec   :  { %v279_v19 = vpop.permute.xlu0 %278 }
 0x7ed   :  { %v281_v20 = vmul.f32 %v279_v19, %v261_v8 }
 0x7ef   :  { %v282_v22 = vpack.c.bf16 %v281_v20, %v281_v20  ;;  %v671_v23 = vsel %vm670_vm7, %v669_v21, %v281_v20 }
 0x7f1   :  { %v284_v24 = vrot.slane %v282_v22, 2 }
 0x7f3   :  { %285 = vrot.lane.b32.xlu1 %v284_v24, %s1919_s21 }
 0x865   :  { %v286_v25 = vpop.permute.xlu1 %285 }
 0x866   :  { %1692 = vmatmul.mubr.msk.bf16.vlgmr.msra.gmra.mrb[4].mxu1 %vm130_vm5, %v286_v25 }
 0x867   :  { %1704 = vmatpush3.bf16.msra.mxu1 %v1988_v27  ;;  %1707 = vmatprep.mubr.msk.bf16.mxu1 %vm1917_vm0, %v1916_v0 }
 0x868   :  { %1705 = vmatprep.subr.bf16.mxu1 %v1916_v0 }
 0x86b   :  { %1706 = vmatpush3.bf16.msra.mxu1 %v1994_v28 }
 0x86c   :  { %1719 = vmatprep.subr.bf16.mxu1 %v1916_v0 }
 0x939   :  { %v324_v26 = vpop.f32.mrb[4].mxu1 }
 0x93a   :  { %v331_v29 = vrot.slane %v324_v26, 2  ;;  %v1693_v30 = vpop.f32.mrb[5].mxu1 }
 0x93b   :  { %v327_v31 = vpop.f32.mrb[6].mxu1 }
 0x93c   :  { %v333_v32 = vadd.f32 %v331_v29, %v1969_v10  ;;  %v1694_v33 = vpop.f32.mrb[7].mxu1 }
 0x93e   :  { %v334_v34 = vmul.f32 0.5, %v333_v32 }
 0x940   :  { %v335_v35 = vsel %vm1971_vm4, %v333_v32, %v334_v34 }
 0x941   :  { %1863 = vtanh.f32 %v335_v35 }
 0x94b   :  { %v1864_v36 = vpop.eup %1863 }
 0x94c   :  { %v337_v37 = vmul.f32 0.5, %v1864_v36 }
 0x94e   :  { %v338_v38 = vadd.f32 0.5, %v337_v37 }
 0x950   :  { %v339_v39 = vsel %vm1971_vm4, %v1864_v36, %v338_v38 }
 0x951   :  { %345 = vrot.lane.b32.xlu0 %v339_v39, %s1918_s20  ;;  %v343_v10 = vmul.f32 %v341_v42, %v339_v39 }
 0x9c3   :  { %v346_v40 = vpop.permute.xlu0 %345 }
 0x9c4   :  { %v348_v41 = vmul.f32 %v346_v40, %v339_v39 }
 0x9c6   :  { %350 = vrot.lane.b32.xlu1 %v348_v41, %s1919_s21 }
 0xa38   :  { %v351_v43 = vpop.permute.xlu1 %350 }
 0xa39   :  { %v353_v44 = vadd.f32 %v351_v43, %v343_v10 }
 0xa3b   :  { %1865 = vtanh.f32 %v353_v44  ;;  %v416_v2 = vrot.slane %v353_v44, 6 }
 0xa45   :  { %v1866_v45 = vpop.eup %1865 }
 0xa46   :  { %356 = vrot.lane.b32.xlu0 %v1866_v45, %s1918_s20 }
 0xab8   :  { %v357_v46 = vpop.permute.xlu0 %356 }
 0xab9   :  { %v359_v47 = vmul.f32 %v357_v46, %v339_v39 }
 0xabb   :  { %v360_v48 = vpack.c.bf16 %v359_v47, %v359_v47  ;;  %v2060_v49 = vsel %vm672_vm8, %v671_v23, %v359_v47 }
 0xabd   :  { %v362_v50 = vrot.slane %v360_v48, 3 }
 0xabf   :  { %363 = vrot.lane.b32.xlu1 %v362_v50, %s1919_s21 }
 0xb31   :  { %v364_v51 = vpop.permute.xlu1 %363 }
 0xb32   :  { %1700 = vmatmul.mubr.msk.bf16.vlgmr.msra.gmra.mrb[8].mxu0 %vm130_vm5, %v364_v51 }
 0xb33   :  { %1712 = vmatpush3.bf16.msra.mxu0 %v1988_v27  ;;  %1715 = vmatprep.mubr.msk.bf16.mxu0 %vm1917_vm0, %v1916_v0 }
 0xb34   :  { %1713 = vmatprep.subr.bf16.mxu0 %v1916_v0 }
 0xb37   :  { %1714 = vmatpush3.bf16.msra.mxu0 %v1994_v28 }
 0xb38   :  { %1727 = vmatprep.subr.bf16.mxu0 %v1916_v0 }
 0xc05   :  { %v402_v52 = vpop.f32.mrb[8].mxu0 }
 0xc06   :  { %v408_v53 = vadd.f32 %v402_v52, %v1976_v15  ;;  %v1701_v54 = vpop.f32.mrb[9].mxu0 }
 0xc07   :  { %v405_v55 = vpop.f32.mrb[10].mxu0 }
 0xc08   :  { %v409_v56 = vmul.f32 0.5, %v408_v53  ;;  %v1702_v57 = vpop.f32.mrb[11].mxu0 }
 0xc0a   :  { %v410_v58 = vsel %vm1971_vm4, %v408_v53, %v409_v56 }
 0xc0b   :  { %1867 = vtanh.f32 %v410_v58 }
 0xc15   :  { %v1868_v59 = vpop.eup %1867 }
 0xc16   :  { %v412_v60 = vmul.f32 0.5, %v1868_v59 }
 0xc18   :  { %v413_v61 = vadd.f32 0.5, %v412_v60 }
 0xc1a   :  { %v414_v62 = vsel %vm1971_vm4, %v1868_v59, %v413_v61 }
 0xc1b   :  { %420 = vrot.lane.b32.xlu0 %v414_v62, %s1918_s20  ;;  %v418_v3 = vmul.f32 %v416_v2, %v414_v62 }
 0xc8d   :  { %v421_v63 = vpop.permute.xlu0 %420 }
 0xc8e   :  { %v423_v1 = vmul.f32 %v421_v63, %v414_v62 }
 0xc90   :  { %425 = vrot.lane.b32.xlu1 %v423_v1, %s1919_s21 }
 0xd02   :  { %v426_v5 = vpop.permute.xlu1 %425 }
 0xd03   :  { %v428_v7 = vadd.f32 %v426_v5, %v418_v3 }
 0xd05   :  { %1869 = vtanh.f32 %v428_v7  ;;  %v493_v30 = vrot.slane %v428_v7, 6 }
 0xd0f   :  { %v1870_v8 = vpop.eup %1869 }
 0xd10   :  { %431 = vrot.lane.b32.xlu0 %v1870_v8, %s1918_s20 }
 0xd82   :  { %v432_v9 = vpop.permute.xlu0 %431 }
 0xd83   :  { %v2078_v11 = vmul.f32 %v432_v9, %v414_v62 }
 0xd85   :  { %v435_v13 = vpack.c.bf16 %v2078_v11, %v2078_v11 }
 0xd87   :  { %437 = vrot.lane.b32.xlu1 %v435_v13, %s1919_s21 }
 0xdf9   :  { %v438_v14 = vpop.permute.xlu1 %437 }
 0xdfa   :  { %1708 = vmatmul.mubr.msk.bf16.vlgmr.msra.gmra.mrb[8].mxu1 %vm130_vm5, %v438_v14 }
 0xdfb   :  { %1720 = vmatpush3.bf16.msra.mxu1 %v1988_v27  ;;  %1723 = vmatprep.mubr.msk.bf16.mxu1 %vm1917_vm0, %v1916_v0 }
 0xdfc   :  { %1721 = vmatprep.subr.bf16.mxu1 %v1916_v0 }
 0xdff   :  { %1722 = vmatpush3.bf16.msra.mxu1 %v1994_v28 }
 0xe00   :  { %1735 = vmatprep.subr.bf16.mxu1 %v1916_v0 }
 0xecd   :  { %v476_v16 = vpop.f32.mrb[8].mxu1 }
 0xece   :  { %v483_v17 = vrot.slane %v476_v16, 6  ;;  %v1709_v18 = vpop.f32.mrb[9].mxu1 }
 0xecf   :  { %v479_v19 = vpop.f32.mrb[10].mxu1 }
 0xed0   :  { %v485_v20 = vadd.f32 %v483_v17, %v1976_v15  ;;  %v1710_v21 = vpop.f32.mrb[11].mxu1 }
 0xed2   :  { %v486_v22 = vmul.f32 0.5, %v485_v20 }
 0xed4   :  { %v487_v27 = vsel %vm1971_vm4, %v485_v20, %v486_v22 }
 0xed5   :  { %1871 = vtanh.f32 %v487_v27 }
 0xedf   :  { %v1872_v23 = vpop.eup %1871 }
 0xee0   :  { %v489_v24 = vmul.f32 0.5, %v1872_v23 }
 0xee2   :  { %v490_v25 = vadd.f32 0.5, %v489_v24  ;;  %v1835_v24 = vld [vmem:[%s2365_s1 + $0x48] sm:$0xff]  }
 0xee4   :  { %v491_v28 = vsel %vm1971_vm4, %v1872_v23, %v490_v25  ;;  %v1836_v25 = vld [vmem:[%s2365_s1 + $0x50] sm:$0xff]  }
 0xee5   :  { %497 = vrot.lane.b32.xlu0 %v491_v28, %s1918_s20  ;;  %v495_v31 = vmul.f32 %v493_v30, %v491_v28  ;;  %v1839_v30 = vld [vmem:[%s2365_s1 + $0x58] sm:$0xff]  }
 0xf57   :  { %v498_v26 = vpop.permute.xlu0 %497 }
 0xf58   :  { %v500_v29 = vmul.f32 %v498_v26, %v491_v28 }
 0xf5a   :  { %502 = vrot.lane.b32.xlu1 %v500_v29, %s1919_s21 }
 0xfcc   :  { %v503_v32 = vpop.permute.xlu1 %502 }
 0xfcd   :  { %v505_v33 = vadd.f32 %v503_v32, %v495_v31 }
 0xfcf   :  { %1873 = vtanh.f32 %v505_v33  ;;  %v571_v54 = vrot.slane %v505_v33, 6  ;;  %v1840_v33 = vld [vmem:[%s2365_s1 + $0x60] sm:$0xff]  }
 0xfd9   :  { %v1874_v34 = vpop.eup %1873 }
 0xfda   :  { %508 = vrot.lane.b32.xlu0 %v1874_v34, %s1918_s20 }
0x104c   :  { %v509_v35 = vpop.permute.xlu0 %508 }
0x104d   :  { %v511_v36 = vmul.f32 %v509_v35, %v491_v28 }
0x104f   :  { %v512_v37 = vpack.c.bf16 %v511_v36, %v511_v36  ;;  %v674_v61 = vsel %vm668_vm6, %v2078_v11, %v511_v36  ;;  %v1841_v36 = vld [vmem:[%s2365_s1 + $0x68] sm:$0xff]  }
0x1051   :  { %v514_v38 = vrot.slane %v512_v37, 1  ;;  %v1842_v37 = vld [vmem:[%s2365_s1 + $0x70] sm:$0xff]  }
0x1053   :  { %515 = vrot.lane.b32.xlu1 %v514_v38, %s1919_s21  ;;  %v1844_v38 = vld [vmem:[%s2365_s1 + $0x80] sm:$0xff]  }
0x10c5   :  { %v516_v39 = vpop.permute.xlu1 %515 }
0x10c6   :  { %1716 = vmatmul.mubr.msk.bf16.vlgmr.msra.gmra.mrb[12].mxu0 %vm130_vm5, %v516_v39  ;;  %v1837_v39 = vld [vmem:[%s2365_s1 + $0x18] sm:$0xff]  }
0x10c7   :  { %1731 = vmatprep.mubr.msk.bf16.mxu0 %vm1917_vm0, %v1916_v0  ;;  %1728 = vmatpush3.bf16.msra.mxu0 %v1835_v24 }
0x10c8   :  { %1729 = vmatprep.subr.bf16.mxu0 %v1916_v0 }
0x10cb   :  { %1730 = vmatpush3.bf16.msra.mxu0 %v1836_v25 }
0x10cc   :  { %1755 = vmatprep.subr.bf16.mxu0 %v1916_v0 }
0x1199   :  { %v554_v40 = vpop.f32.mrb[12].mxu0 }
0x119a   :  { %v561_v41 = vrot.slane %v554_v40, 4  ;;  %v1717_v42 = vpop.f32.mrb[13].mxu0 }
0x119b   :  { %v557_v10 = vpop.f32.mrb[14].mxu0 }
0x119c   :  { %v563_v43 = vadd.f32 %v561_v41, %v1976_v15  ;;  %v1718_v44 = vpop.f32.mrb[15].mxu0  ;;  %v1838_v41 = vld [vmem:[%s2365_s1 + $0x20] sm:$0xff]   ;;  %v1845_v10 = vld [vmem:[%s2365_s1 + $0x88] sm:$0xff]  }
0x119d   :  { %v684_v44 = vsub.s32 3, %v1960_v4 }
0x119e   :  { %v564_v45 = vmul.f32 0.5, %v563_v43 }
0x11a0   :  { %v565_v46 = vsel %vm1971_vm4, %v563_v43, %v564_v45  ;;  %v1846_v43 = vld [vmem:[%s2365_s1 + $0x90] sm:$0xff]   ;;  %v685_v45 = vrot.slane %v1966_v6, %v684_v44 }
0x11a1   :  { %1875 = vtanh.f32 %v565_v46 }
0x11ab   :  { %v1876_v47 = vpop.eup %1875 }
0x11ac   :  { %v567_v48 = vmul.f32 0.5, %v1876_v47 }
0x11ae   :  { %v568_v50 = vadd.f32 0.5, %v567_v48 }
0x11b0   :  { %v569_v51 = vsel %vm1971_vm4, %v1876_v47, %v568_v50  ;;  %v870_v50 = vsub.s32 1, %v1960_v4 }
0x11b1   :  { %575 = vrot.lane.b32.xlu0 %v569_v51, %s1918_s20  ;;  %v573_v55 = vmul.f32 %v571_v54, %v569_v51 }
0x1223   :  { %v576_v52 = vpop.permute.xlu0 %575 }
0x1224   :  { %v578_v53 = vmul.f32 %v576_v52, %v569_v51 }
0x1226   :  { %580 = vrot.lane.b32.xlu1 %v578_v53, %s1919_s21 }
0x1298   :  { %v581_v56 = vpop.permute.xlu1 %580 }
0x1299   :  { %v583_v57 = vadd.f32 %v581_v56, %v573_v55  ;;  %v871_v56 = vrot.slane %v1966_v6, %v870_v50 }
0x129b   :  { %1877 = vtanh.f32 %v583_v57  ;;  %v649_v22 = vrot.slane %v583_v57, 6 }
0x12a5   :  { %v1878_v58 = vpop.eup %1877 }
0x12a6   :  { %586 = vrot.lane.b32.xlu0 %v1878_v58, %s1918_s20 }
0x1318   :  { %v587_v59 = vpop.permute.xlu0 %586 }
0x1319   :  { %v589_v60 = vmul.f32 %v587_v59, %v569_v51 }
0x131b   :  { %v590_v62 = vpack.c.bf16 %v589_v60, %v589_v60  ;;  %v675_v63 = vsel %vm670_vm7, %v674_v61, %v589_v60 }
0x131d   :  { %v592_v1 = vrot.slane %v590_v62, 2 }
0x131f   :  { %593 = vrot.lane.b32.xlu1 %v592_v1, %s1919_s21 }
0x1391   :  { %v594_v2 = vpop.permute.xlu1 %593 }
0x1392   :  { %1724 = vmatmul.mubr.msk.bf16.vlgmr.msra.gmra.mrb[12].mxu1 %vm130_vm5, %v594_v2 }
0x1393   :  { %1751 = vmatprep.mubr.msk.bf16.mxu1 %vm1917_vm0, %v1916_v0  ;;  %1736 = vmatpush3.bf16.msra.mxu1 %v1839_v30 }
0x1394   :  { %1737 = vmatprep.subr.bf16.mxu1 %v1916_v0 }
0x1397   :  { %1738 = vmatpush3.bf16.msra.mxu1 %v1840_v33 }
0x1398   :  { %1739 = vmatprep.subr.bf16.mxu1 %v1916_v0 }
0x139b   :  { %1740 = vmatpush3.bf16.msra.mxu1 %v1841_v36 }
0x139c   :  { %1741 = vmatprep.subr.bf16.mxu1 %v1916_v0 }
0x139f   :  { %1742 = vmatpush3.bf16.msra.mxu1 %v1842_v37 }
0x13a0   :  { %1743 = vmatprep.subr.bf16.mxu1 %v1916_v0 }
0x1465   :  { %v632_v3 = vpop.f32.mrb[12].mxu1 }
0x1466   :  { %v639_v5 = vrot.slane %v632_v3, 2  ;;  %v1725_v7 = vpop.f32.mrb[13].mxu1 }
0x1467   :  { %v635_v8 = vpop.f32.mrb[14].mxu1 }
0x1468   :  { %v641_v9 = vadd.f32 %v639_v5, %v1976_v15  ;;  %v1726_v13 = vpop.f32.mrb[15].mxu1 }
0x1469   :  { %v766_v13 = vsub.s32 4, %v1960_v4 }
0x146a   :  { %v642_v11 = vmul.f32 0.5, %v641_v9 }
0x146c   :  { %v643_v14 = vsel %vm1971_vm4, %v641_v9, %v642_v11  ;;  %v767_v11 = vrot.slane %v1966_v6, %v766_v13  ;;  %v2210_v6 = vld [vmem:[%s2365_s1 + $0x28] sm:$0xff]  }
0x146d   :  { %1879 = vtanh.f32 %v643_v14 }
0x1477   :  { %v1880_v16 = vpop.eup %1879 }
0x1478   :  { %v645_v17 = vmul.f32 0.5, %v1880_v16 }
0x147a   :  { %v646_v18 = vadd.f32 0.5, %v645_v17 }
0x147c   :  { %v647_v19 = vsel %vm1971_vm4, %v1880_v16, %v646_v18 }
0x147d   :  { %653 = vrot.lane.b32.xlu0 %v647_v19, %s1918_s20  ;;  %v651_v15 = vmul.f32 %v649_v22, %v647_v19 }
0x14ef   :  { %v654_v20 = vpop.permute.xlu0 %653 }
0x14f0   :  { %v656_v21 = vmul.f32 %v654_v20, %v647_v19 }
0x14f2   :  { %658 = vrot.lane.b32.xlu1 %v656_v21, %s1919_s21 }
0x1564   :  { %v659_v27 = vpop.permute.xlu1 %658 }
0x1565   :  { %v661_v23 = vadd.f32 %v659_v27, %v651_v15  ;;  %v2216_v27 = vld [vmem:[%s2365_s1 + $0x30] sm:$0xff]  }
0x1567   :  { %1881 = vtanh.f32 %v661_v23 }
0x1571   :  { %v1882_v28 = vpop.eup %1881 }
0x1572   :  { %664 = vrot.lane.b32.xlu0 %v1882_v28, %s1918_s20 }
0x15e4   :  { %v665_v26 = vpop.permute.xlu0 %664 }
0x15e5   :  { %v667_v29 = vmul.f32 %v665_v26, %v647_v19 }
0x15e7   :  { %v863_v31 = vpack.c.bf16 %v667_v29, %v667_v29  ;;  %v676_v32 = vsel %vm672_vm8, %v675_v63, %v667_v29 }
0x15e8   :  { %v677_v34 = vpack.c.bf16 %v676_v32, %v2060_v49  ;;  %v1843_v49 = vld [vmem:[%s2365_s1 + $0x78] sm:$0xff]  }
0x15e9   :  { %v873_v35 = vrot.slane %v863_v31, 3  ;;  %1744 = vmatpush3.bf16.msra.mxu1 %v1843_v49 }
0x15ea   :  { %687 = vrot.lane.b32.xlu1 %v677_v34, %s1919_s21  ;;  %1745 = vmatprep.subr.bf16.mxu1 %v1916_v0 }
0x15eb   :  { %874 = vrot.lane.b32.xlu0 %v873_v35, %s1919_s21 }
0x15ed   :  { %1746 = vmatpush3.bf16.msra.mxu1 %v1844_v38 }
0x15ee   :  { %1747 = vmatprep.subr.bf16.mxu1 %v1916_v0 }
0x15f1   :  { %1748 = vmatpush3.bf16.msra.mxu1 %v1845_v10 }
0x15f2   :  { %1749 = vmatprep.subr.bf16.mxu1 %v1916_v0 }
0x15f5   :  { %1750 = vmatpush3.bf16.msra.mxu1 %v1846_v43 }
0x15f6   :  { %1787 = vmatprep.subr.bf16.mxu1 %v1916_v0 }
0x165c   :  { %v688_v40 = vpop.permute.xlu1 %687 }
0x165d   :  { %1732 = vmatmul.mubr.msk.bf16.vlgmr.msra.gmra.mrb[16].mxu0 %vm130_vm5, %v688_v40  ;;  %v875_v42 = vpop.permute.xlu0 %874 }
0x165e   :  { %1756 = vmatpush3.bf16.msra.mxu0 %v1837_v39  ;;  %1759 = vmatprep.mubr.msk.bf16.mxu0 %vm1917_vm0, %v1916_v0 }
0x165f   :  { %1757 = vmatprep.subr.bf16.mxu0 %v1916_v0 }
0x1662   :  { %1758 = vmatpush3.bf16.msra.mxu0 %v1838_v41 }
0x1663   :  { %1763 = vmatprep.subr.bf16.mxu0 %v1916_v0 }
0x1665   :  { %1760 = vmatmul.mubr.msk.bf16.vlgmr.msra.gmra.mrb[20].mxu0 %vm130_vm5, %v875_v42 }
0x1666   :  { %1767 = vmatprep.mubr.msk.bf16.mxu0 %vm1917_vm0, %v1916_v0  ;;  %1764 = vmatpush3.bf16.msra.mxu0 %v2210_v6 }
0x1667   :  { %1765 = vmatprep.subr.bf16.mxu0 %v1916_v0 }
0x166a   :  { %1766 = vmatpush3.bf16.msra.mxu0 %v2216_v27 }
0x166b   :  { %1771 = vmatprep.subr.bf16.mxu0 %v1916_v0 }
0x1730   :  { %v738_v46 = vpop.f32.mrb[16].mxu0 }
0x1731   :  { %v739_v47 = vadd.f32 %v738_v46, %v685_v45  ;;  %v1733_v48 = vpop.f32.mrb[17].mxu0 }
0x1732   :  { %v741_v51 = vpop.f32.mrb[18].mxu0 }
0x1733   :  { %v742_v52 = vadd.f32 %v741_v51, %v685_v45  ;;  %v1734_v53 = vpop.f32.mrb[19].mxu0  ;;  %v745_v54 = vmax.f32 %v739_v47, 0.0 }
0x1735   :  { %v746_v55 = vmax.f32 %v742_v52, 0.0 }
0x1737   :  { %v747_v57 = vpack.c.bf16 %v746_v55, %v745_v54 }
0x1738   :  { %v925_v58 = vpop.f32.mrb[20].mxu0 }
0x1739   :  { %v2187_v59 = vadd.f32 %v925_v58, %v871_v56  ;;  %1752 = vmatmul.mubr.bf16.vlgmr.msra.gmra.mrb[16].mxu1 %v747_v57  ;;  %v1761_v60 = vpop.f32.mrb[21].mxu0 }
0x173a   :  { %v928_v61 = vpop.f32.mrb[22].mxu0  ;;  %1791 = vmatprep.mubr.msk.bf16.mxu1 %vm1917_vm0, %v1916_v0  ;;  %1788 = vmatpush3.bf16.msra.mxu1 %v2210_v6 }
0x173b   :  { %v1762_v62 = vpop.f32.mrb[23].mxu0  ;;  %v931_v63 = vmul.f32 0.5, %v2187_v59  ;;  %1789 = vmatprep.subr.bf16.mxu1 %v1916_v0 }
0x173d   :  { %v932_v1 = vsel %vm1971_vm4, %v2187_v59, %v931_v63 }
0x173e   :  { %1883 = vtanh.f32 %v932_v1  ;;  %1790 = vmatpush3.bf16.msra.mxu1 %v2216_v27 }
0x173f   :  { %1803 = vmatprep.subr.bf16.mxu1 %v1916_v0 }
0x1748   :  { %v1884_v2 = vpop.eup %1883 }
0x1749   :  { %v934_v3 = vmul.f32 0.5, %v1884_v2 }
0x174b   :  { %v935_v5 = vadd.f32 0.5, %v934_v3 }
0x174d   :  { %v936_v7 = vsel %vm1971_vm4, %v1884_v2, %v935_v5 }
0x174e   :  { %939 = vrot.lane.b32.xlu1 %v936_v7, %s1918_s20  ;;  %v937_v21 = vmul.f32 0.0, %v936_v7 }
0x17c0   :  { %v940_v8 = vpop.permute.xlu1 %939 }
0x17c1   :  { %v942_v9 = vmul.f32 %v940_v8, %v936_v7 }
0x17c3   :  { %944 = vrot.lane.b32.xlu0 %v942_v9, %s1919_s21 }
0x180c   :  { %v850_v14 = vpop.f32.mrb[16].mxu1 }
0x180d   :  { %v851_v16 = vadd.f32 %v850_v14, %v767_v11  ;;  %v1753_v17 = vpop.f32.mrb[17].mxu1 }
0x180e   :  { %v853_v18 = vpop.f32.mrb[18].mxu1 }
0x180f   :  { %857 = vst [vmem:[%s2368_s4] sm:$0xff] %v851_v16  ;;  %v854_v19 = vadd.f32 %v853_v18, %v767_v11  ;;  %v1754_v20 = vpop.f32.mrb[19].mxu1 }
0x1811   :  { %858 = vst [vmem:[%s2368_s4 + $0x8] sm:$0xff] %v854_v19 }
0x1835   :  { %v945_v22 = vpop.permute.xlu0 %944 }
0x1836   :  { %v947_v15 = vadd.f32 %v945_v22, %v937_v21 }
0x1838   :  { %1885 = vtanh.f32 %v947_v15 }
0x1842   :  { %v1886_v23 = vpop.eup %1885 }
0x1843   :  { %950 = vrot.lane.b32.xlu1 %v1886_v23, %s1918_s20 }
0x18b5   :  { %v951_v24 = vpop.permute.xlu1 %950 }
0x18b6   :  { %v2226_v25 = vmul.f32 %v951_v24, %v936_v7 }
0x18b8   :  { %v954_v28 = vpack.c.bf16 %v2226_v25, %v2226_v25 }
0x18ba   :  { %956 = vrot.lane.b32.xlu0 %v954_v28, %s1919_s21 }
0x192c   :  { %v957_v26 = vpop.permute.xlu0 %956 }
0x192d   :  { %1768 = vmatmul.mubr.msk.bf16.vlgmr.msra.gmra.mrb[24].mxu0 %vm130_vm5, %v957_v26 }
0x192e   :  { %1772 = vmatpush3.bf16.msra.mxu0 %v2210_v6  ;;  %1775 = vmatprep.mubr.msk.bf16.mxu0 %vm1917_vm0, %v1916_v0 }
0x192f   :  { %1773 = vmatprep.subr.bf16.mxu0 %v1916_v0 }
0x1932   :  { %1774 = vmatpush3.bf16.msra.mxu0 %v2216_v27 }
0x1933   :  { %1779 = vmatprep.subr.bf16.mxu0 %v1916_v0 }
0x1a00   :  { %v1007_v29 = vpop.f32.mrb[24].mxu0 }
0x1a01   :  { %v1013_v30 = vadd.f32 %v1007_v29, %v2187_v59  ;;  %v1769_v31 = vpop.f32.mrb[25].mxu0 }
0x1a02   :  { %v1010_v32 = vpop.f32.mrb[26].mxu0 }
0x1a03   :  { %v1014_v33 = vmul.f32 0.5, %v1013_v30  ;;  %v1770_v34 = vpop.f32.mrb[27].mxu0 }
0x1a05   :  { %v1015_v35 = vsel %vm1971_vm4, %v1013_v30, %v1014_v33 }
0x1a06   :  { %1887 = vtanh.f32 %v1015_v35 }
0x1a10   :  { %v1888_v36 = vpop.eup %1887 }
0x1a11   :  { %v1017_v37 = vmul.f32 0.5, %v1888_v36 }
0x1a13   :  { %v1018_v49 = vadd.f32 0.5, %v1017_v37 }
0x1a15   :  { %v1019_v38 = vsel %vm1971_vm4, %v1888_v36, %v1018_v49 }
0x1a16   :  { %1022 = vrot.lane.b32.xlu1 %v1019_v38, %s1918_s20  ;;  %v1020_v41 = vmul.f32 %v1019_v38, %v947_v15 }
0x1a88   :  { %v1023_v39 = vpop.permute.xlu1 %1022 }
0x1a89   :  { %v1025_v40 = vmul.f32 %v1023_v39, %v1019_v38 }
0x1a8b   :  { %1027 = vrot.lane.b32.xlu0 %v1025_v40, %s1919_s21 }
0x1afd   :  { %v1028_v42 = vpop.permute.xlu0 %1027 }
0x1afe   :  { %v1030_v10 = vadd.f32 %v1028_v42, %v1020_v41 }
0x1b00   :  { %1889 = vtanh.f32 %v1030_v10 }
0x1b0a   :  { %v1890_v43 = vpop.eup %1889 }
0x1b0b   :  { %1033 = vrot.lane.b32.xlu1 %v1890_v43, %s1918_s20 }
0x1b7d   :  { %v1034_v44 = vpop.permute.xlu1 %1033 }
0x1b7e   :  { %v1036_v45 = vmul.f32 %v1034_v44, %v1019_v38 }
0x1b80   :  { %v1037_v46 = vpack.c.bf16 %v1036_v45, %v1036_v45  ;;  %v1464_v5 = vrot.slane %v1036_v45, 6 }
0x1b82   :  { %1039 = vrot.lane.b32.xlu0 %v1037_v46, %s1919_s21  ;;  %v1481_v11 = vsel %vm668_vm6, %v2226_v25, %v1464_v5 }
0x1bf4   :  { %v1040_v47 = vpop.permute.xlu0 %1039 }
0x1bf5   :  { %1776 = vmatmul.mubr.msk.bf16.vlgmr.msra.gmra.mrb[28].mxu0 %vm130_vm5, %v1040_v47 }
0x1bf6   :  { %1780 = vmatpush3.bf16.msra.mxu0 %v2210_v6  ;;  %1783 = vmatprep.mubr.msk.bf16.mxu0 %vm1917_vm0, %v1916_v0 }
0x1bf7   :  { %1781 = vmatprep.subr.bf16.mxu0 %v1916_v0 }
0x1bfa   :  { %1782 = vmatpush3.bf16.msra.mxu0 %v2216_v27 }
0x1bfb   :  { %1795 = vmatprep.subr.bf16.mxu0 %v1916_v0 }
0x1cc8   :  { %v1078_v48 = vpop.f32.mrb[28].mxu0 }
0x1cc9   :  { %v1084_v50 = vadd.f32 %v1078_v48, %v2187_v59  ;;  %v1777_v51 = vpop.f32.mrb[29].mxu0 }
0x1cca   :  { %v1081_v52 = vpop.f32.mrb[30].mxu0 }
0x1ccb   :  { %v1085_v53 = vmul.f32 0.5, %v1084_v50  ;;  %v1778_v54 = vpop.f32.mrb[31].mxu0 }
0x1ccd   :  { %v1086_v55 = vsel %vm1971_vm4, %v1084_v50, %v1085_v53 }
0x1cce   :  { %1891 = vtanh.f32 %v1086_v55 }
0x1cd8   :  { %v1892_v56 = vpop.eup %1891 }
0x1cd9   :  { %v1088_v57 = vmul.f32 0.5, %v1892_v56 }
0x1cdb   :  { %v1089_v58 = vadd.f32 0.5, %v1088_v57 }
0x1cdd   :  { %v1090_v60 = vsel %vm1971_vm4, %v1892_v56, %v1089_v58 }
0x1cde   :  { %1093 = vrot.lane.b32.xlu1 %v1090_v60, %s1918_s20  ;;  %v1091_v63 = vmul.f32 %v1090_v60, %v1030_v10 }
0x1d50   :  { %v1094_v61 = vpop.permute.xlu1 %1093 }
0x1d51   :  { %v1096_v62 = vmul.f32 %v1094_v61, %v1090_v60 }
0x1d53   :  { %1098 = vrot.lane.b32.xlu0 %v1096_v62, %s1919_s21 }
0x1dc5   :  { %v1099_v1 = vpop.permute.xlu0 %1098 }
0x1dc6   :  { %v1101_v2 = vadd.f32 %v1099_v1, %v1091_v63 }
0x1dc8   :  { %1893 = vtanh.f32 %v1101_v2 }
0x1dd2   :  { %v1894_v3 = vpop.eup %1893 }
0x1dd3   :  { %1104 = vrot.lane.b32.xlu1 %v1894_v3, %s1918_s20 }
0x1e45   :  { %v1105_v7 = vpop.permute.xlu1 %1104 }
0x1e46   :  { %v1107_v8 = vmul.f32 %v1105_v7, %v1090_v60 }
0x1e48   :  { %v1108_v9 = vpack.c.bf16 %v1107_v8, %v1107_v8  ;;  %v1467_v13 = vrot.slane %v1107_v8, 4 }
0x1e4a   :  { %v1482_v14 = vsel %vm670_vm7, %v1481_v11, %v1467_v13  ;;  %1110 = vrot.lane.b32.xlu0 %v1108_v9, %s1919_s21 }
0x1ebc   :  { %v1111_v16 = vpop.permute.xlu0 %1110 }
0x1ebd   :  { %1784 = vmatmul.mubr.msk.bf16.vlgmr.msra.gmra.mrb[32].mxu0 %vm130_vm5, %v1111_v16 }
0x1ebe   :  { %1796 = vmatpush3.bf16.msra.mxu0 %v2210_v6  ;;  %1799 = vmatprep.mubr.msk.bf16.mxu0 %vm1917_vm0, %v1916_v0 }
0x1ebf   :  { %1797 = vmatprep.subr.bf16.mxu0 %v1916_v0 }
0x1ec2   :  { %1798 = vmatpush3.bf16.msra.mxu0 %v2216_v27 }
0x1ec3   :  { %1811 = vmatprep.subr.bf16.mxu0 %v1916_v0 }
0x1f90   :  { %v1149_v17 = vpop.f32.mrb[32].mxu0 }
0x1f91   :  { %v1155_v18 = vadd.f32 %v1149_v17, %v2187_v59  ;;  %v1785_v19 = vpop.f32.mrb[33].mxu0 }
0x1f92   :  { %v1152_v20 = vpop.f32.mrb[34].mxu0 }
0x1f93   :  { %v1156_v21 = vmul.f32 0.5, %v1155_v18  ;;  %v1786_v22 = vpop.f32.mrb[35].mxu0 }
0x1f95   :  { %v1157_v15 = vsel %vm1971_vm4, %v1155_v18, %v1156_v21 }
0x1f96   :  { %1895 = vtanh.f32 %v1157_v15 }
0x1fa0   :  { %v1896_v23 = vpop.eup %1895 }
0x1fa1   :  { %v1159_v24 = vmul.f32 0.5, %v1896_v23 }
0x1fa3   :  { %v1160_v25 = vadd.f32 0.5, %v1159_v24 }
0x1fa5   :  { %v1161_v28 = vsel %vm1971_vm4, %v1896_v23, %v1160_v25 }
0x1fa6   :  { %1164 = vrot.lane.b32.xlu1 %v1161_v28, %s1918_s20  ;;  %v1162_v30 = vmul.f32 %v1161_v28, %v1101_v2 }
0x2018   :  { %v1165_v26 = vpop.permute.xlu1 %1164 }
0x2019   :  { %v1167_v29 = vmul.f32 %v1165_v26, %v1161_v28 }
0x201b   :  { %1169 = vrot.lane.b32.xlu0 %v1167_v29, %s1919_s21 }
0x208d   :  { %v1170_v31 = vpop.permute.xlu0 %1169 }
0x208e   :  { %v1172_v32 = vadd.f32 %v1170_v31, %v1162_v30 }
0x2090   :  { %1897 = vtanh.f32 %v1172_v32 }
0x209a   :  { %v1898_v33 = vpop.eup %1897 }
0x209b   :  { %1175 = vrot.lane.b32.xlu1 %v1898_v33, %s1918_s20 }
0x210d   :  { %v1176_v34 = vpop.permute.xlu1 %1175 }
0x210e   :  { %v1178_v35 = vmul.f32 %v1176_v34, %v1161_v28 }
0x2110   :  { %v1179_v36 = vpack.c.bf16 %v1178_v35, %v1178_v35  ;;  %v1470_v37 = vrot.slane %v1178_v35, 2 }
0x2112   :  { %1181 = vrot.lane.b32.xlu0 %v1179_v36, %s1919_s21  ;;  %v2283_v49 = vsel %vm672_vm8, %v1482_v14, %v1470_v37 }
0x2184   :  { %v1182_v38 = vpop.permute.xlu0 %1181 }
0x2185   :  { %1792 = vmatmul.mubr.msk.bf16.vlgmr.msra.gmra.mrb[20].mxu1 %vm130_vm5, %v1182_v38 }
0x2186   :  { %1804 = vmatpush3.bf16.msra.mxu1 %v2210_v6  ;;  %1807 = vmatprep.mubr.msk.bf16.mxu1 %vm1917_vm0, %v1916_v0 }
0x2187   :  { %1805 = vmatprep.subr.bf16.mxu1 %v1916_v0 }
0x218a   :  { %1806 = vmatpush3.bf16.msra.mxu1 %v2216_v27 }
0x218b   :  { %1819 = vmatprep.subr.bf16.mxu1 %v1916_v0 }
0x2258   :  { %v1220_v39 = vpop.f32.mrb[20].mxu1 }
0x2259   :  { %v1226_v40 = vadd.f32 %v1220_v39, %v2187_v59  ;;  %v1793_v41 = vpop.f32.mrb[21].mxu1 }
0x225a   :  { %v1223_v42 = vpop.f32.mrb[22].mxu1 }
0x225b   :  { %v1227_v10 = vmul.f32 0.5, %v1226_v40  ;;  %v1794_v43 = vpop.f32.mrb[23].mxu1 }
0x225d   :  { %v1228_v44 = vsel %vm1971_vm4, %v1226_v40, %v1227_v10 }
0x225e   :  { %1899 = vtanh.f32 %v1228_v44 }
0x2268   :  { %v1900_v45 = vpop.eup %1899 }
0x2269   :  { %v1230_v46 = vmul.f32 0.5, %v1900_v45 }
0x226b   :  { %v1231_v47 = vadd.f32 0.5, %v1230_v46 }
0x226d   :  { %v1232_v48 = vsel %vm1971_vm4, %v1900_v45, %v1231_v47 }
0x226e   :  { %1235 = vrot.lane.b32.xlu1 %v1232_v48, %s1918_s20  ;;  %v1233_v52 = vmul.f32 %v1232_v48, %v1172_v32 }
0x22e0   :  { %v1236_v50 = vpop.permute.xlu1 %1235 }
0x22e1   :  { %v1238_v51 = vmul.f32 %v1236_v50, %v1232_v48 }
0x22e3   :  { %1240 = vrot.lane.b32.xlu0 %v1238_v51, %s1919_s21 }
0x2355   :  { %v1241_v53 = vpop.permute.xlu0 %1240 }
0x2356   :  { %v1243_v54 = vadd.f32 %v1241_v53, %v1233_v52 }
0x2358   :  { %1901 = vtanh.f32 %v1243_v54 }
0x2362   :  { %v1902_v55 = vpop.eup %1901 }
0x2363   :  { %1246 = vrot.lane.b32.xlu1 %v1902_v55, %s1918_s20 }
0x23d5   :  { %v1247_v56 = vpop.permute.xlu1 %1246 }
0x23d6   :  { %v2300_v57 = vmul.f32 %v1247_v56, %v1232_v48 }
0x23d8   :  { %v1250_v58 = vpack.c.bf16 %v2300_v57, %v2300_v57 }
0x23da   :  { %1252 = vrot.lane.b32.xlu0 %v1250_v58, %s1919_s21 }
0x244c   :  { %v1253_v60 = vpop.permute.xlu0 %1252 }
0x244d   :  { %1800 = vmatmul.mubr.msk.bf16.vlgmr.msra.gmra.mrb[36].mxu0 %vm130_vm5, %v1253_v60 }
0x244e   :  { %1812 = vmatpush3.bf16.msra.mxu0 %v2210_v6  ;;  %1815 = vmatprep.mubr.msk.bf16.mxu0 %vm1917_vm0, %v1916_v0 }
0x244f   :  { %1813 = vmatprep.subr.bf16.mxu0 %v1916_v0 }
0x2452   :  { %1814 = vmatpush3.bf16.msra.mxu0 %v2216_v27 }
0x2520   :  { %v1291_v61 = vpop.f32.mrb[36].mxu0 }
0x2521   :  { %v1297_v62 = vadd.f32 %v1291_v61, %v2187_v59  ;;  %v1801_v63 = vpop.f32.mrb[37].mxu0 }
0x2522   :  { %v1294_v1 = vpop.f32.mrb[38].mxu0  ;;  %v1849_v63 = vld [vmem:[%s2365_s1 + $0x38] sm:$0xff]  }
0x2523   :  { %v1298_v2 = vmul.f32 0.5, %v1297_v62  ;;  %v1802_v3 = vpop.f32.mrb[39].mxu0 }
0x2525   :  { %v1299_v5 = vsel %vm1971_vm4, %v1297_v62, %v1298_v2 }
0x2526   :  { %1903 = vtanh.f32 %v1299_v5 }
0x2530   :  { %v1904_v7 = vpop.eup %1903 }
0x2531   :  { %v1301_v6 = vmul.f32 0.5, %v1904_v7 }
0x2533   :  { %v1302_v8 = vadd.f32 0.5, %v1301_v6 }
0x2535   :  { %v1303_v9 = vsel %vm1971_vm4, %v1904_v7, %v1302_v8 }
0x2536   :  { %1306 = vrot.lane.b32.xlu1 %v1303_v9, %s1918_s20  ;;  %v1304_v11 = vmul.f32 %v1303_v9, %v1243_v54 }
0x25a8   :  { %v1307_v27 = vpop.permute.xlu1 %1306 }
0x25a9   :  { %v1309_v13 = vmul.f32 %v1307_v27, %v1303_v9 }
0x25ab   :  { %1311 = vrot.lane.b32.xlu0 %v1309_v13, %s1919_s21 }
0x261d   :  { %v1312_v14 = vpop.permute.xlu0 %1311 }
0x261e   :  { %v1314_v16 = vadd.f32 %v1312_v14, %v1304_v11 }
0x2620   :  { %1905 = vtanh.f32 %v1314_v16 }
0x262a   :  { %v1906_v17 = vpop.eup %1905 }
0x262b   :  { %1317 = vrot.lane.b32.xlu1 %v1906_v17, %s1918_s20 }
0x269d   :  { %v1318_v18 = vpop.permute.xlu1 %1317 }
0x269e   :  { %v1320_v19 = vmul.f32 %v1318_v18, %v1303_v9  ;;  %v1494_v9 = vsub.s32 2, %v1960_v4 }
0x26a0   :  { %v1321_v20 = vpack.c.bf16 %v1320_v19, %v1320_v19  ;;  %v1473_v39 = vrot.slane %v1320_v19, 6 }
0x26a2   :  { %1323 = vrot.lane.b32.xlu0 %v1321_v20, %s1919_s21  ;;  %v1484_v43 = vsel %vm668_vm6, %v2300_v57, %v1473_v39 }
0x2714   :  { %v1324_v21 = vpop.permute.xlu0 %1323 }
0x2715   :  { %1808 = vmatmul.mubr.msk.bf16.vlgmr.msra.gmra.mrb[24].mxu1 %vm130_vm5, %v1324_v21 }
0x2716   :  { %1823 = vmatprep.mubr.msk.bf16.mxu1 %vm1917_vm0, %v1916_v0  ;;  %1820 = vmatpush3.bf16.msra.mxu1 %v1849_v63 }
0x2717   :  { %1821 = vmatprep.subr.bf16.mxu1 %v1916_v0  ;;  %v1915_v0 = vld [vmem:[%s2367_s2] sm:$0x1f] }
0x2718   :  { %v1495_v27 = vrot.slane %v1915_v0, %v1494_v9 }
0x271a   :  { %1822 = vmatpush3.bf16.msra.mxu1 %v1850_v12 }
0x27e8   :  { %v1362_v22 = vpop.f32.mrb[24].mxu1 }
0x27e9   :  { %v1368_v15 = vadd.f32 %v1362_v22, %v2187_v59  ;;  %v1809_v23 = vpop.f32.mrb[25].mxu1 }
0x27ea   :  { %v1365_v24 = vpop.f32.mrb[26].mxu1 }
0x27eb   :  { %v1369_v25 = vmul.f32 0.5, %v1368_v15  ;;  %v1810_v28 = vpop.f32.mrb[27].mxu1 }
0x27ed   :  { %v1370_v26 = vsel %vm1971_vm4, %v1368_v15, %v1369_v25 }
0x27ee   :  { %1907 = vtanh.f32 %v1370_v26 }
0x27f8   :  { %v1908_v29 = vpop.eup %1907 }
0x27f9   :  { %v1372_v30 = vmul.f32 0.5, %v1908_v29 }
0x27fb   :  { %v1373_v31 = vadd.f32 0.5, %v1372_v30 }
0x27fd   :  { %v1374_v32 = vsel %vm1971_vm4, %v1908_v29, %v1373_v31 }
0x27fe   :  { %1377 = vrot.lane.b32.xlu1 %v1374_v32, %s1918_s20  ;;  %v1375_v35 = vmul.f32 %v1374_v32, %v1314_v16 }
0x2870   :  { %v1378_v33 = vpop.permute.xlu1 %1377 }
0x2871   :  { %v1380_v34 = vmul.f32 %v1378_v33, %v1374_v32 }
0x2873   :  { %1382 = vrot.lane.b32.xlu0 %v1380_v34, %s1919_s21 }
0x28e5   :  { %v1383_v36 = vpop.permute.xlu0 %1382 }
0x28e6   :  { %v1385_v37 = vadd.f32 %v1383_v36, %v1375_v35 }
0x28e8   :  { %1909 = vtanh.f32 %v1385_v37 }
0x28f2   :  { %v1910_v38 = vpop.eup %1909 }
0x28f3   :  { %1388 = vrot.lane.b32.xlu1 %v1910_v38, %s1918_s20 }
0x2965   :  { %v1389_v40 = vpop.permute.xlu1 %1388 }
0x2966   :  { %v1391_v41 = vmul.f32 %v1389_v40, %v1374_v32 }
0x2968   :  { %v1392_v42 = vpack.c.bf16 %v1391_v41, %v1391_v41  ;;  %v1476_v10 = vrot.slane %v1391_v41, 4 }
0x296a   :  { %v1485_v44 = vsel %vm670_vm7, %v1484_v43, %v1476_v10  ;;  %1394 = vrot.lane.b32.xlu0 %v1392_v42, %s1919_s21 }
0x29dc   :  { %v1395_v45 = vpop.permute.xlu0 %1394 }
0x29dd   :  { %1816 = vmatmul.mubr.msk.bf16.vlgmr.msra.gmra.mrb[40].mxu0 %vm130_vm5, %v1395_v45 }
0x2ab0   :  { %v1433_v46 = vpop.f32.mrb[40].mxu0 }
0x2ab1   :  { %v1439_v47 = vadd.f32 %v1433_v46, %v2187_v59  ;;  %v1817_v48 = vpop.f32.mrb[41].mxu0 }
0x2ab2   :  { %v1436_v50 = vpop.f32.mrb[42].mxu0 }
0x2ab3   :  { %v1440_v51 = vmul.f32 0.5, %v1439_v47  ;;  %v1818_v52 = vpop.f32.mrb[43].mxu0 }
0x2ab5   :  { %v1441_v53 = vsel %vm1971_vm4, %v1439_v47, %v1440_v51 }
0x2ab6   :  { %1911 = vtanh.f32 %v1441_v53 }
0x2ac0   :  { %v1912_v54 = vpop.eup %1911 }
0x2ac1   :  { %v1443_v55 = vmul.f32 0.5, %v1912_v54 }
0x2ac3   :  { %v1444_v56 = vadd.f32 0.5, %v1443_v55 }
0x2ac5   :  { %v1445_v57 = vsel %vm1971_vm4, %v1912_v54, %v1444_v56 }
0x2ac6   :  { %1448 = vrot.lane.b32.xlu1 %v1445_v57, %s1918_s20  ;;  %v1446_v59 = vmul.f32 %v1445_v57, %v1385_v37 }
0x2b38   :  { %v1449_v58 = vpop.permute.xlu1 %1448 }
0x2b39   :  { %v1451_v60 = vmul.f32 %v1449_v58, %v1445_v57 }
0x2b3b   :  { %1453 = vrot.lane.b32.xlu0 %v1451_v60, %s1919_s21 }
0x2bad   :  { %v1454_v61 = vpop.permute.xlu0 %1453 }
0x2bae   :  { %v1456_v62 = vadd.f32 %v1454_v61, %v1446_v59 }
0x2bb0   :  { %1913 = vtanh.f32 %v1456_v62 }
0x2bba   :  { %v1914_v1 = vpop.eup %1913 }
0x2bbb   :  { %1459 = vrot.lane.b32.xlu1 %v1914_v1, %s1918_s20 }
0x2c2d   :  { %v1460_v2 = vpop.permute.xlu1 %1459 }
0x2c2e   :  { %v1462_v3 = vmul.f32 %v1460_v2, %v1445_v57 }
0x2c30   :  { %v1479_v5 = vrot.slane %v1462_v3, 2 }
0x2c32   :  { %v1486_v7 = vsel %vm672_vm8, %v1485_v44, %v1479_v5 }
0x2c33   :  { %v1487_v6 = vpack.c.bf16 %v1486_v7, %v2283_v49 }
0x2c35   :  { %1497 = vrot.lane.b32.xlu0 %v1487_v6, %s1919_s21 }
0x2ca7   :  { %v1498_v8 = vpop.permute.xlu0 %1497 }
0x2ca8   :  { %1824 = vmatmul.mubr.msk.bf16.vlgmr.msra.gmra.mrb[28].mxu1 %vm130_vm5, %v1498_v8 }
0x2d7b   :  { %v1548_v13 = vpop.f32.mrb[28].mxu1 }
0x2d7c   :  { %v1549_v11 = vadd.f32 %v1548_v13, %v1495_v27  ;;  %v1825_v14 = vpop.f32.mrb[29].mxu1 }
0x2d7d   :  { %v1551_v16 = vpop.f32.mrb[30].mxu1 }
0x2d7e   :  { %1555 = vst [vmem:[%s2369_s3] sm:$0xff] %v1549_v11  ;;  %v1552_v49 = vadd.f32 %v1551_v16, %v1495_v27  ;;  %v1826_v17 = vpop.f32.mrb[31].mxu1 }
0x2d80   :  { %1556 = vst [vmem:[%s2369_s3 + $0x8] sm:$0xff] %v1552_v49 }

</bundles_post_ra>
